<compile_context>
chip_gen: v5e
topology: v5e:2x2
jax: 0.10.0
libtpu: 0.0.40
codegen_flags: <defaults>
</compile_context>

<pallas_src>
import functools

import jax
import jax.numpy as jnp
from jax.experimental import pallas as pl
from jax.experimental.pallas import tpu as pltpu


def _conv_stats_kernel(x_ref, w_ref, y_ref, stats_ref, *, tile_h, W, Cin, Cp, rate):
    """Dilated 3x3 conv (im2col matmul on MXU) + per-tile BN partial sums.

    x_ref:     (1, H + 2*rate, W + 2*rate, Cin)  padded image of batch element n
    w_ref:     (9, Cin, Cp)                      weight slab (tap-major, Cout padded)
    y_ref:     (1, tile_h, W, Cp)                conv output tile, f32
    stats_ref: (1, 1, 8, Cp)                     row 0 = sum, row 1 = sum of squares
    """
    h = pl.program_id(1)
    row0 = pl.multiple_of(h * tile_h, tile_h)     # first output row of this tile
    m = tile_h * W

    w_all = w_ref[...]                            # hoisted once; resident slab
    acc = jnp.zeros((m, Cp), jnp.float32)
    for kh in range(3):
        for kw in range(3):
            # Halo'd window of the padded input for this tap (kw offset static,
            # kh offset dynamic only through the grid index).
            patch = x_ref[0,
                          pl.ds(row0 + kh * rate, tile_h),
                          pl.ds(kw * rate, W),
                          :]                      # (tile_h, W, Cin)
            acc += jnp.dot(patch.reshape(m, Cin), w_all[kh * 3 + kw],
                           preferred_element_type=jnp.float32)

    y_ref[...] = acc.reshape(1, tile_h, W, Cp)

    # One-pass BN partials for this tile (finalized outside the kernel).
    s1 = jnp.sum(acc, axis=0, keepdims=True)          # (1, Cp)
    s2 = jnp.sum(acc * acc, axis=0, keepdims=True)    # (1, Cp)
    pad = jnp.zeros((6, Cp), jnp.float32)
    stats_ref[...] = jnp.concatenate([s1, s2, pad], axis=0).reshape(1, 1, 8, Cp)


def _bn_apply_kernel(y_ref, scale_ref, shift_ref, o_ref):
    """out = y * scale + shift  (scale/shift fold mean, var, gamma, beta)."""
    o_ref[...] = y_ref[...] * scale_ref[...] + shift_ref[...]


def _pick_tile_h(H, max_tile=8):
    """Largest divisor of H that is <= max_tile (keeps several grid steps for
    pipelining at the demo shapes; at production sizes budget against VMEM)."""
    for t in range(min(H, max_tile), 0, -1):
        if H % t == 0:
            return t
    return 1


@functools.partial(jax.jit, static_argnames=("rate", "eps", "compute_dtype", "tile_h"))
def aspp_forward(x_nchw, w_oihw, bias, gamma, beta, *, rate, eps=1e-5,
                 compute_dtype=jnp.bfloat16, tile_h=None):
    """NCHW in / NCHW out, matching the PyTorch module's forward."""
    N, Cin, H, W = x_nchw.shape
    Cout = w_oihw.shape[0]
    Cp = ((Cout + 127) // 128) * 128            # lane-dense channel padding
    if tile_h is None:
        tile_h = _pick_tile_h(H)
    assert H % tile_h == 0
    num_h = H // tile_h
    Hp, Wp = H + 2 * rate, W + 2 * rate

    # Conv bias is a per-channel constant -> cancels exactly against the
    # training-mode BN batch mean; drop it (one fewer operand / DMA).
    del bias

    # Layout glue: NCHW -> NHWC, zero-pad spatially by `rate` (padding=rate,
    # dilation=rate, stride=1, k=3 keeps spatial size unchanged).
    x_nhwc = jnp.transpose(x_nchw, (0, 2, 3, 1))
    x_pad = jnp.pad(x_nhwc, ((0, 0), (rate, rate), (rate, rate), (0, 0)))
    x_pad = x_pad.astype(compute_dtype)

    # (Cout, Cin, 3, 3) -> (3, 3, Cin, Cout) -> (9, Cin, Cout) -> pad Cout to Cp.
    w_slab = jnp.transpose(w_oihw, (2, 3, 1, 0)).reshape(9, Cin, Cout)
    w_slab = jnp.pad(w_slab, ((0, 0), (0, 0), (0, Cp - Cout))).astype(compute_dtype)

    kern1 = functools.partial(_conv_stats_kernel, tile_h=tile_h, W=W, Cin=Cin,
                              Cp=Cp, rate=rate)
    itemsize = jnp.dtype(compute_dtype).itemsize
    cost1 = pl.CostEstimate(
        flops=2 * N * H * W * 9 * Cin * Cp,
        transcendentals=0,
        bytes_accessed=(x_pad.size * itemsize + w_slab.size * itemsize
                        + N * H * W * Cp * 4 + N * num_h * 8 * Cp * 4))

    y, stats = pl.pallas_call(
        kern1,
        out_shape=(jax.ShapeDtypeStruct((N, H, W, Cp), jnp.float32),
                   jax.ShapeDtypeStruct((N, num_h, 8, Cp), jnp.float32)),
        grid=(N, num_h),
        in_specs=[
            # Full padded image of batch element n: block index is constant in
            # h, so it is DMA'd once per n and stays resident for its row tiles.
            pl.BlockSpec((1, Hp, Wp, Cin), lambda n, h: (n, 0, 0, 0)),
            # Weight slab: constant block -> resident across the whole grid.
            pl.BlockSpec((9, Cin, Cp), lambda n, h: (0, 0, 0)),
        ],
        out_specs=(
            pl.BlockSpec((1, tile_h, W, Cp), lambda n, h: (n, h, 0, 0)),
            pl.BlockSpec((1, 1, 8, Cp), lambda n, h: (n, h, 0, 0)),
        ),
        compiler_params=pltpu.CompilerParams(
            dimension_semantics=("parallel", "parallel"),
            vmem_limit_bytes=32 * 1024 * 1024),
        cost_estimate=cost1,
    )(x_pad, w_slab)

    # Finalize BN statistics: tiny per-channel math on the per-tile partials.
    cnt = jnp.float32(N * H * W)
    s1 = jnp.sum(stats[:, :, 0, :], axis=(0, 1))             # (Cp,)
    s2 = jnp.sum(stats[:, :, 1, :], axis=(0, 1))             # (Cp,)
    mean = s1 / cnt
    var = jnp.maximum(s2 / cnt - mean * mean, 0.0)            # E[x^2] - mean^2
    gamma_p = jnp.pad(gamma.astype(jnp.float32), (0, Cp - Cout))
    beta_p = jnp.pad(beta.astype(jnp.float32), (0, Cp - Cout))
    scale = gamma_p * jax.lax.rsqrt(var + eps)
    shift = beta_p - mean * scale
    # TODO(synk): running_mean / running_var buffer updates are not modeled
    # (they do not affect the training-mode forward output).

    cost2 = pl.CostEstimate(flops=2 * N * H * W * Cp, transcendentals=0,
                            bytes_accessed=2 * N * H * W * Cp * 4 + 2 * Cp * 4)
    out_p = pl.pallas_call(
        _bn_apply_kernel,
        out_shape=jax.ShapeDtypeStruct((N, H, W, Cp), jnp.float32),
        grid=(N, num_h),
        in_specs=[
            pl.BlockSpec((1, tile_h, W, Cp), lambda n, h: (n, h, 0, 0)),
            pl.BlockSpec((1, Cp), lambda n, h: (0, 0)),
            pl.BlockSpec((1, Cp), lambda n, h: (0, 0)),
        ],
        out_specs=pl.BlockSpec((1, tile_h, W, Cp), lambda n, h: (n, h, 0, 0)),
        compiler_params=pltpu.CompilerParams(
            dimension_semantics=("parallel", "parallel"),
            vmem_limit_bytes=32 * 1024 * 1024),
        cost_estimate=cost2,
        input_output_aliases={0: 0},    # y is dead after this call; reuse its HBM
    )(y, scale.reshape(1, Cp), shift.reshape(1, Cp))

    # Drop the channel padding, back to NCHW.
    return jnp.transpose(out_p[..., :Cout], (0, 3, 1, 2))


def _reference(x_nchw, w_oihw, bias, gamma, beta, *, rate, eps=1e-5):
    """Pure-JAX reference (same semantics as the PyTorch forward)."""
    y = jax.lax.conv_general_dilated(
        x_nchw, w_oihw, window_strides=(1, 1),
        padding=[(rate, rate), (rate, rate)],
        rhs_dilation=(rate, rate),
        dimension_numbers=("NCHW", "OIHW", "NCHW"),
        precision=jax.lax.Precision.HIGHEST)
    y = y + bias[None, :, None, None]
    mean = jnp.mean(y, axis=(0, 2, 3), keepdims=True)
    var = jnp.mean((y - mean) ** 2, axis=(0, 2, 3), keepdims=True)
    yhat = (y - mean) / jnp.sqrt(var + eps)
    return gamma[None, :, None, None] * yhat + beta[None, :, None, None]


if __name__ == "__main__":
    # Small shapes consistent with ASPP(inplanes=4, planes=8, rate=2)
    N, Cin, H, W = 2, 4, 16, 16
    Cout, rate = 8, 2

    key = jax.random.PRNGKey(0)
    kx, kw, kb, kg, kbeta = jax.random.split(key, 5)
    x = jax.random.normal(kx, (N, Cin, H, W), jnp.float32)           # [2, 4, 16, 16]
    w = 0.1 * jax.random.normal(kw, (Cout, Cin, 3, 3), jnp.float32)  # Conv2d weight
    b = 0.1 * jax.random.normal(kb, (Cout,), jnp.float32)            # Conv2d bias
    gamma = 1.0 + 0.1 * jax.random.normal(kg, (Cout,), jnp.float32)  # BN weight
    beta = 0.1 * jax.random.normal(kbeta, (Cout,), jnp.float32)      # BN bias

    out = aspp_forward(x, w, b, gamma, beta, rate=rate)
    out = jax.block_until_ready(out)
    assert out.shape == (N, Cout, H, W), out.shape

    # (a) Apples-to-apples check: reference whose conv operands are rounded to
    #     bf16 exactly like the kernel's MXU inputs (f32 accumulation in both).
    ref_bf16 = _reference(x.astype(jnp.bfloat16).astype(jnp.float32),
                          w.astype(jnp.bfloat16).astype(jnp.float32),
                          b, gamma, beta, rate=rate)
    assert jnp.allclose(out, ref_bf16, atol=1e-2, rtol=1e-2), (
        float(jnp.max(jnp.abs(out - ref_bf16))))

    # (b) Loose sanity check against the pure-f32 reference (difference is the
    #     inherent bf16 operand rounding of the MXU path).
    ref_f32 = _reference(x, w, b, gamma, beta, rate=rate)
    assert jnp.allclose(out, ref_f32, atol=5e-2, rtol=5e-2), (
        float(jnp.max(jnp.abs(out - ref_f32))))

    print("KERNEL_OK")
</pallas_src>

<mosaic_0001>
module attributes {stable_mosaic.version = 11 : i64} {
  func.func @_conv_stats_kernel(%arg0: i32, %arg1: i32, %arg2: memref<1x20x20x4xbf16, #tpu.memory_space<vmem>>, %arg3: memref<9x4x128xbf16, #tpu.memory_space<vmem>>, %arg4: memref<1x8x16x128xf32, #tpu.memory_space<vmem>>, %arg5: memref<1x1x8x128xf32, #tpu.memory_space<vmem>>) attributes {dimension_semantics = [#tpu.dimension_semantics<parallel>, #tpu.dimension_semantics<parallel>], iteration_bounds = array<i64: 2, 2>, scalar_prefetch = 0 : i64, scratch_operands = 0 : i64, tpu.core_type = #tpu.core_type<tc>, window_params = [{transform_indices = @transform_0, window_bounds = array<i64: 1, 20, 20, 4>}, {pipeline_mode = #tpu.pipeline_mode<synchronous>, transform_indices = @transform_1, window_bounds = array<i64: 9, 4, 128>}, {transform_indices = @transform_2, window_bounds = array<i64: 1, 8, 16, 128>}, {transform_indices = @transform_3, window_bounds = array<i64: 1, 1, 8, 128>}]} {
    %c8_i32 = arith.constant 8 : i32
    %0 = arith.muli %arg1, %c8_i32 : i32
    %1 = tpu.assume_multiple %0, 8 : i32
    %c0 = arith.constant 0 : index
    %c0_0 = arith.constant 0 : index
    %c0_1 = arith.constant 0 : index
    %2 = vector.load %arg3[%c0, %c0_0, %c0_1] : memref<9x4x128xbf16, #tpu.memory_space<vmem>>, vector<9x4x128xbf16>
    %cst = arith.constant 0.000000e+00 : f32
    %3 = vector.broadcast %cst : f32 to vector<128x128xf32>
    %c0_i32 = arith.constant 0 : i32
    %4 = arith.addi %1, %c0_i32 : i32
    %c0_2 = arith.constant 0 : index
    %5 = arith.index_cast %4 : i32 to index
    %c0_3 = arith.constant 0 : index
    %c0_4 = arith.constant 0 : index
    %6 = vector.load %arg2[%c0_2, %5, %c0_3, %c0_4] : memref<1x20x20x4xbf16, #tpu.memory_space<vmem>>, vector<1x8x16x4xbf16>
    %7 = vector.shape_cast %6 : vector<1x8x16x4xbf16> to vector<8x16x4xbf16>
    %8 = vector.shape_cast %7 : vector<8x16x4xbf16> to vector<128x4xbf16>
    %9 = vector.extract_strided_slice %2 {offsets = [0, 0, 0], sizes = [1, 4, 128], strides = [1, 1, 1]} : vector<9x4x128xbf16> to vector<1x4x128xbf16>
    %10 = vector.shape_cast %9 : vector<1x4x128xbf16> to vector<4x128xbf16>
    %cst_5 = arith.constant dense<0.000000e+00> : vector<128x128xf32>
    %11 = tpu.matmul %8, %10, %cst_5 {dimension_numbers = #tpu.dot_dimension_numbers<[1], [0], [0], [1], [0, 0, 1, 1], [], []>} : vector<128x4xbf16>, vector<4x128xbf16>, vector<128x128xf32> -> vector<128x128xf32>
    %12 = arith.addf %3, %11 : vector<128x128xf32>
    %c0_i32_6 = arith.constant 0 : i32
    %13 = arith.addi %1, %c0_i32_6 : i32
    %c0_7 = arith.constant 0 : index
    %14 = arith.index_cast %13 : i32 to index
    %c2 = arith.constant 2 : index
    %c0_8 = arith.constant 0 : index
    %15 = vector.load %arg2[%c0_7, %14, %c2, %c0_8] : memref<1x20x20x4xbf16, #tpu.memory_space<vmem>>, vector<1x8x16x4xbf16>
    %16 = vector.shape_cast %15 : vector<1x8x16x4xbf16> to vector<8x16x4xbf16>
    %17 = vector.shape_cast %16 : vector<8x16x4xbf16> to vector<128x4xbf16>
    %18 = vector.extract_strided_slice %2 {offsets = [1, 0, 0], sizes = [1, 4, 128], strides = [1, 1, 1]} : vector<9x4x128xbf16> to vector<1x4x128xbf16>
    %19 = vector.shape_cast %18 : vector<1x4x128xbf16> to vector<4x128xbf16>
    %cst_9 = arith.constant dense<0.000000e+00> : vector<128x128xf32>
    %20 = tpu.matmul %17, %19, %cst_9 {dimension_numbers = #tpu.dot_dimension_numbers<[1], [0], [0], [1], [0, 0, 1, 1], [], []>} : vector<128x4xbf16>, vector<4x128xbf16>, vector<128x128xf32> -> vector<128x128xf32>
    %21 = arith.addf %12, %20 : vector<128x128xf32>
    %c0_i32_10 = arith.constant 0 : i32
    %22 = arith.addi %1, %c0_i32_10 : i32
    %c0_11 = arith.constant 0 : index
    %23 = arith.index_cast %22 : i32 to index
    %c4 = arith.constant 4 : index
    %c0_12 = arith.constant 0 : index
    %24 = vector.load %arg2[%c0_11, %23, %c4, %c0_12] : memref<1x20x20x4xbf16, #tpu.memory_space<vmem>>, vector<1x8x16x4xbf16>
    %25 = vector.shape_cast %24 : vector<1x8x16x4xbf16> to vector<8x16x4xbf16>
    %26 = vector.shape_cast %25 : vector<8x16x4xbf16> to vector<128x4xbf16>
    %27 = vector.extract_strided_slice %2 {offsets = [2, 0, 0], sizes = [1, 4, 128], strides = [1, 1, 1]} : vector<9x4x128xbf16> to vector<1x4x128xbf16>
    %28 = vector.shape_cast %27 : vector<1x4x128xbf16> to vector<4x128xbf16>
    %cst_13 = arith.constant dense<0.000000e+00> : vector<128x128xf32>
    %29 = tpu.matmul %26, %28, %cst_13 {dimension_numbers = #tpu.dot_dimension_numbers<[1], [0], [0], [1], [0, 0, 1, 1], [], []>} : vector<128x4xbf16>, vector<4x128xbf16>, vector<128x128xf32> -> vector<128x128xf32>
    %30 = arith.addf %21, %29 : vector<128x128xf32>
    %c2_i32 = arith.constant 2 : i32
    %31 = arith.addi %1, %c2_i32 : i32
    %c0_14 = arith.constant 0 : index
    %32 = arith.index_cast %31 : i32 to index
    %c0_15 = arith.constant 0 : index
    %c0_16 = arith.constant 0 : index
    %33 = vector.load %arg2[%c0_14, %32, %c0_15, %c0_16] : memref<1x20x20x4xbf16, #tpu.memory_space<vmem>>, vector<1x8x16x4xbf16>
    %34 = vector.shape_cast %33 : vector<1x8x16x4xbf16> to vector<8x16x4xbf16>
    %35 = vector.shape_cast %34 : vector<8x16x4xbf16> to vector<128x4xbf16>
    %36 = vector.extract_strided_slice %2 {offsets = [3, 0, 0], sizes = [1, 4, 128], strides = [1, 1, 1]} : vector<9x4x128xbf16> to vector<1x4x128xbf16>
    %37 = vector.shape_cast %36 : vector<1x4x128xbf16> to vector<4x128xbf16>
    %cst_17 = arith.constant dense<0.000000e+00> : vector<128x128xf32>
    %38 = tpu.matmul %35, %37, %cst_17 {dimension_numbers = #tpu.dot_dimension_numbers<[1], [0], [0], [1], [0, 0, 1, 1], [], []>} : vector<128x4xbf16>, vector<4x128xbf16>, vector<128x128xf32> -> vector<128x128xf32>
    %39 = arith.addf %30, %38 : vector<128x128xf32>
    %c2_i32_18 = arith.constant 2 : i32
    %40 = arith.addi %1, %c2_i32_18 : i32
    %c0_19 = arith.constant 0 : index
    %41 = arith.index_cast %40 : i32 to index
    %c2_20 = arith.constant 2 : index
    %c0_21 = arith.constant 0 : index
    %42 = vector.load %arg2[%c0_19, %41, %c2_20, %c0_21] : memref<1x20x20x4xbf16, #tpu.memory_space<vmem>>, vector<1x8x16x4xbf16>
    %43 = vector.shape_cast %42 : vector<1x8x16x4xbf16> to vector<8x16x4xbf16>
    %44 = vector.shape_cast %43 : vector<8x16x4xbf16> to vector<128x4xbf16>
    %45 = vector.extract_strided_slice %2 {offsets = [4, 0, 0], sizes = [1, 4, 128], strides = [1, 1, 1]} : vector<9x4x128xbf16> to vector<1x4x128xbf16>
    %46 = vector.shape_cast %45 : vector<1x4x128xbf16> to vector<4x128xbf16>
    %cst_22 = arith.constant dense<0.000000e+00> : vector<128x128xf32>
    %47 = tpu.matmul %44, %46, %cst_22 {dimension_numbers = #tpu.dot_dimension_numbers<[1], [0], [0], [1], [0, 0, 1, 1], [], []>} : vector<128x4xbf16>, vector<4x128xbf16>, vector<128x128xf32> -> vector<128x128xf32>
    %48 = arith.addf %39, %47 : vector<128x128xf32>
    %c2_i32_23 = arith.constant 2 : i32
    %49 = arith.addi %1, %c2_i32_23 : i32
    %c0_24 = arith.constant 0 : index
    %50 = arith.index_cast %49 : i32 to index
    %c4_25 = arith.constant 4 : index
    %c0_26 = arith.constant 0 : index
    %51 = vector.load %arg2[%c0_24, %50, %c4_25, %c0_26] : memref<1x20x20x4xbf16, #tpu.memory_space<vmem>>, vector<1x8x16x4xbf16>
    %52 = vector.shape_cast %51 : vector<1x8x16x4xbf16> to vector<8x16x4xbf16>
    %53 = vector.shape_cast %52 : vector<8x16x4xbf16> to vector<128x4xbf16>
    %54 = vector.extract_strided_slice %2 {offsets = [5, 0, 0], sizes = [1, 4, 128], strides = [1, 1, 1]} : vector<9x4x128xbf16> to vector<1x4x128xbf16>
    %55 = vector.shape_cast %54 : vector<1x4x128xbf16> to vector<4x128xbf16>
    %cst_27 = arith.constant dense<0.000000e+00> : vector<128x128xf32>
    %56 = tpu.matmul %53, %55, %cst_27 {dimension_numbers = #tpu.dot_dimension_numbers<[1], [0], [0], [1], [0, 0, 1, 1], [], []>} : vector<128x4xbf16>, vector<4x128xbf16>, vector<128x128xf32> -> vector<128x128xf32>
    %57 = arith.addf %48, %56 : vector<128x128xf32>
    %c4_i32 = arith.constant 4 : i32
    %58 = arith.addi %1, %c4_i32 : i32
    %c0_28 = arith.constant 0 : index
    %59 = arith.index_cast %58 : i32 to index
    %c0_29 = arith.constant 0 : index
    %c0_30 = arith.constant 0 : index
    %60 = vector.load %arg2[%c0_28, %59, %c0_29, %c0_30] : memref<1x20x20x4xbf16, #tpu.memory_space<vmem>>, vector<1x8x16x4xbf16>
    %61 = vector.shape_cast %60 : vector<1x8x16x4xbf16> to vector<8x16x4xbf16>
    %62 = vector.shape_cast %61 : vector<8x16x4xbf16> to vector<128x4xbf16>
    %63 = vector.extract_strided_slice %2 {offsets = [6, 0, 0], sizes = [1, 4, 128], strides = [1, 1, 1]} : vector<9x4x128xbf16> to vector<1x4x128xbf16>
    %64 = vector.shape_cast %63 : vector<1x4x128xbf16> to vector<4x128xbf16>
    %cst_31 = arith.constant dense<0.000000e+00> : vector<128x128xf32>
    %65 = tpu.matmul %62, %64, %cst_31 {dimension_numbers = #tpu.dot_dimension_numbers<[1], [0], [0], [1], [0, 0, 1, 1], [], []>} : vector<128x4xbf16>, vector<4x128xbf16>, vector<128x128xf32> -> vector<128x128xf32>
    %66 = arith.addf %57, %65 : vector<128x128xf32>
    %c4_i32_32 = arith.constant 4 : i32
    %67 = arith.addi %1, %c4_i32_32 : i32
    %c0_33 = arith.constant 0 : index
    %68 = arith.index_cast %67 : i32 to index
    %c2_34 = arith.constant 2 : index
    %c0_35 = arith.constant 0 : index
    %69 = vector.load %arg2[%c0_33, %68, %c2_34, %c0_35] : memref<1x20x20x4xbf16, #tpu.memory_space<vmem>>, vector<1x8x16x4xbf16>
    %70 = vector.shape_cast %69 : vector<1x8x16x4xbf16> to vector<8x16x4xbf16>
    %71 = vector.shape_cast %70 : vector<8x16x4xbf16> to vector<128x4xbf16>
    %72 = vector.extract_strided_slice %2 {offsets = [7, 0, 0], sizes = [1, 4, 128], strides = [1, 1, 1]} : vector<9x4x128xbf16> to vector<1x4x128xbf16>
    %73 = vector.shape_cast %72 : vector<1x4x128xbf16> to vector<4x128xbf16>
    %cst_36 = arith.constant dense<0.000000e+00> : vector<128x128xf32>
    %74 = tpu.matmul %71, %73, %cst_36 {dimension_numbers = #tpu.dot_dimension_numbers<[1], [0], [0], [1], [0, 0, 1, 1], [], []>} : vector<128x4xbf16>, vector<4x128xbf16>, vector<128x128xf32> -> vector<128x128xf32>
    %75 = arith.addf %66, %74 : vector<128x128xf32>
    %c4_i32_37 = arith.constant 4 : i32
    %76 = arith.addi %1, %c4_i32_37 : i32
    %c0_38 = arith.constant 0 : index
    %77 = arith.index_cast %76 : i32 to index
    %c4_39 = arith.constant 4 : index
    %c0_40 = arith.constant 0 : index
    %78 = vector.load %arg2[%c0_38, %77, %c4_39, %c0_40] : memref<1x20x20x4xbf16, #tpu.memory_space<vmem>>, vector<1x8x16x4xbf16>
    %79 = vector.shape_cast %78 : vector<1x8x16x4xbf16> to vector<8x16x4xbf16>
    %80 = vector.shape_cast %79 : vector<8x16x4xbf16> to vector<128x4xbf16>
    %81 = vector.extract_strided_slice %2 {offsets = [8, 0, 0], sizes = [1, 4, 128], strides = [1, 1, 1]} : vector<9x4x128xbf16> to vector<1x4x128xbf16>
    %82 = vector.shape_cast %81 : vector<1x4x128xbf16> to vector<4x128xbf16>
    %cst_41 = arith.constant dense<0.000000e+00> : vector<128x128xf32>
    %83 = tpu.matmul %80, %82, %cst_41 {dimension_numbers = #tpu.dot_dimension_numbers<[1], [0], [0], [1], [0, 0, 1, 1], [], []>} : vector<128x4xbf16>, vector<4x128xbf16>, vector<128x128xf32> -> vector<128x128xf32>
    %84 = arith.addf %75, %83 : vector<128x128xf32>
    %85 = vector.shape_cast %84 : vector<128x128xf32> to vector<1x8x16x128xf32>
    %c0_42 = arith.constant 0 : index
    %c0_43 = arith.constant 0 : index
    %c0_44 = arith.constant 0 : index
    %c0_45 = arith.constant 0 : index
    %86 = vector.load %arg4[%c0_42, %c0_43, %c0_44, %c0_45] : memref<1x8x16x128xf32, #tpu.memory_space<vmem>>, vector<1x8x16x128xf32>
    tpu.vector_store %arg4[%c0_42, %c0_43, %c0_44, %c0_45], %85 {strides = array<i32>} : memref<1x8x16x128xf32, #tpu.memory_space<vmem>>, vector<1x8x16x128xf32>,
    %cst_46 = arith.constant dense<0.000000e+00> : vector<128xf32>
    %87 = vector.multi_reduction <add>, %84, %cst_46 [0] : vector<128x128xf32> to vector<128xf32>
    %88 = vector.shape_cast %87 : vector<128xf32> to vector<1x128xf32>
    %89 = arith.mulf %84, %84 : vector<128x128xf32>
    %cst_47 = arith.constant dense<0.000000e+00> : vector<128xf32>
    %90 = vector.multi_reduction <add>, %89, %cst_47 [0] : vector<128x128xf32> to vector<128xf32>
    %91 = vector.shape_cast %90 : vector<128xf32> to vector<1x128xf32>
    %cst_48 = arith.constant 0.000000e+00 : f32
    %92 = vector.broadcast %cst_48 : f32 to vector<6x128xf32>
    %93 = tpu.concatenate %88, %91, %92 in 0 : vector<1x128xf32>, vector<1x128xf32>, vector<6x128xf32> -> vector<8x128xf32>
    %94 = vector.shape_cast %93 : vector<8x128xf32> to vector<1x1x8x128xf32>
    %c0_49 = arith.constant 0 : index
    %c0_50 = arith.constant 0 : index
    %c0_51 = arith.constant 0 : index
    %c0_52 = arith.constant 0 : index
    %95 = vector.load %arg5[%c0_49, %c0_50, %c0_51, %c0_52] : memref<1x1x8x128xf32, #tpu.memory_space<vmem>>, vector<1x1x8x128xf32>
    tpu.vector_store %arg5[%c0_49, %c0_50, %c0_51, %c0_52], %94 {strides = array<i32>} : memref<1x1x8x128xf32, #tpu.memory_space<vmem>>, vector<1x1x8x128xf32>,
    return
  }
  func.func @transform_0(%arg0: i32, %arg1: i32) -> (i32, i32, i32, i32) {
    %c0_i32 = arith.constant 0 : i32
    %c0_i32_0 = arith.constant 0 : i32
    %c0_i32_1 = arith.constant 0 : i32
    %c0_i32_2 = arith.constant 0 : i32
    return %arg0, %c0_i32, %c0_i32_0, %c0_i32_1 : i32, i32, i32, i32
  }
  func.func @transform_1(%arg0: i32, %arg1: i32) -> (i32, i32, i32) {
    %c0_i32 = arith.constant 0 : i32
    %c0_i32_0 = arith.constant 0 : i32
    %c0_i32_1 = arith.constant 0 : i32
    %c0_i32_2 = arith.constant 0 : i32
    return %c0_i32, %c0_i32_0, %c0_i32_1 : i32, i32, i32
  }
  func.func @transform_2(%arg0: i32, %arg1: i32) -> (i32, i32, i32, i32) {
    %c0_i32 = arith.constant 0 : i32
    %c0_i32_0 = arith.constant 0 : i32
    %c0_i32_1 = arith.constant 0 : i32
    return %arg0, %arg1, %c0_i32, %c0_i32_0 : i32, i32, i32, i32
  }
  func.func @transform_3(%arg0: i32, %arg1: i32) -> (i32, i32, i32, i32) {
    %c0_i32 = arith.constant 0 : i32
    %c0_i32_0 = arith.constant 0 : i32
    %c0_i32_1 = arith.constant 0 : i32
    return %arg0, %arg1, %c0_i32, %c0_i32_0 : i32, i32, i32, i32
  }
}

module attributes {stable_mosaic.version = 11 : i64} {
  func.func @_bn_apply_kernel(%arg0: i32, %arg1: i32, %arg2: memref<1x8x16x128xf32, #tpu.memory_space<vmem>>, %arg3: memref<1x128xf32, #tpu.memory_space<vmem>>, %arg4: memref<1x128xf32, #tpu.memory_space<vmem>>, %arg5: memref<1x8x16x128xf32, #tpu.memory_space<vmem>>) attributes {dimension_semantics = [#tpu.dimension_semantics<parallel>, #tpu.dimension_semantics<parallel>], iteration_bounds = array<i64: 2, 2>, scalar_prefetch = 0 : i64, scratch_operands = 0 : i64, tpu.core_type = #tpu.core_type<tc>, window_params = [{transform_indices = @transform_0, window_bounds = array<i64: 1, 8, 16, 128>}, {pipeline_mode = #tpu.pipeline_mode<synchronous>, transform_indices = @transform_1, window_bounds = array<i64: 1, 128>}, {pipeline_mode = #tpu.pipeline_mode<synchronous>, transform_indices = @transform_2, window_bounds = array<i64: 1, 128>}, {transform_indices = @transform_3, window_bounds = array<i64: 1, 8, 16, 128>}]} {
    %c0 = arith.constant 0 : index
    %c0_0 = arith.constant 0 : index
    %c0_1 = arith.constant 0 : index
    %c0_2 = arith.constant 0 : index
    %0 = vector.load %arg2[%c0, %c0_0, %c0_1, %c0_2] : memref<1x8x16x128xf32, #tpu.memory_space<vmem>>, vector<1x8x16x128xf32>
    %c0_3 = arith.constant 0 : index
    %c0_4 = arith.constant 0 : index
    %1 = vector.load %arg3[%c0_3, %c0_4] : memref<1x128xf32, #tpu.memory_space<vmem>>, vector<1x128xf32>
    %2 = vector.shape_cast %1 : vector<1x128xf32> to vector<1x1x1x128xf32>
    %3 = vector.broadcast %2 : vector<1x1x1x128xf32> to vector<1x8x16x128xf32>
    %4 = arith.mulf %0, %3 : vector<1x8x16x128xf32>
    %c0_5 = arith.constant 0 : index
    %c0_6 = arith.constant 0 : index
    %5 = vector.load %arg4[%c0_5, %c0_6] : memref<1x128xf32, #tpu.memory_space<vmem>>, vector<1x128xf32>
    %6 = vector.shape_cast %5 : vector<1x128xf32> to vector<1x1x1x128xf32>
    %7 = vector.broadcast %6 : vector<1x1x1x128xf32> to vector<1x8x16x128xf32>
    %8 = arith.addf %4, %7 : vector<1x8x16x128xf32>
    %c0_7 = arith.constant 0 : index
    %c0_8 = arith.constant 0 : index
    %c0_9 = arith.constant 0 : index
    %c0_10 = arith.constant 0 : index
    %9 = vector.load %arg5[%c0_7, %c0_8, %c0_9, %c0_10] : memref<1x8x16x128xf32, #tpu.memory_space<vmem>>, vector<1x8x16x128xf32>
    tpu.vector_store %arg5[%c0_7, %c0_8, %c0_9, %c0_10], %8 {strides = array<i32>} : memref<1x8x16x128xf32, #tpu.memory_space<vmem>>, vector<1x8x16x128xf32>,
    return
  }
  func.func @transform_0(%arg0: i32, %arg1: i32) -> (i32, i32, i32, i32) {
    %c0_i32 = arith.constant 0 : i32
    %c0_i32_0 = arith.constant 0 : i32
    %c0_i32_1 = arith.constant 0 : i32
    return %arg0, %arg1, %c0_i32, %c0_i32_0 : i32, i32, i32, i32
  }
  func.func @transform_1(%arg0: i32, %arg1: i32) -> (i32, i32) {
    %c0_i32 = arith.constant 0 : i32
    %c0_i32_0 = arith.constant 0 : i32
    %c0_i32_1 = arith.constant 0 : i32
    return %c0_i32, %c0_i32_0 : i32, i32
  }
  func.func @transform_2(%arg0: i32, %arg1: i32) -> (i32, i32) {
    %c0_i32 = arith.constant 0 : i32
    %c0_i32_0 = arith.constant 0 : i32
    %c0_i32_1 = arith.constant 0 : i32
    return %c0_i32, %c0_i32_0 : i32, i32
  }
  func.func @transform_3(%arg0: i32, %arg1: i32) -> (i32, i32, i32, i32) {
    %c0_i32 = arith.constant 0 : i32
    %c0_i32_0 = arith.constant 0 : i32
    %c0_i32_1 = arith.constant 0 : i32
    return %arg0, %arg1, %c0_i32, %c0_i32_0 : i32, i32, i32, i32
  }
}

</mosaic_0001>

<bundles_post_ra>
// kernel: aspp_forward.3
= control target key start
LH: loop header
LB: loop body
LE: loop exit
PB: predicated region body
PF: predicated region fallthrough
CT: control target
= control target key end

     0   :  { %s503_s12 = smov 0   ;;  %s505_s13 = smov 0   ;;  %s578_s0 = inlined_call_operand.vmem [shape: f32[2,16,16,128], index: 0, kind: input, shape index: {}, may-alias: {0,3}]   ;;  %s579_s1 = inlined_call_operand.vmem [shape: f32[1,128], index: 1, kind: input, shape index: {}]   ;;  %s580_s2 = inlined_call_operand.vmem [shape: f32[1,128], index: 2, kind: input, shape index: {}]   ;;  %s581_s3 = inlined_call_operand.vmem [shape: f32[2,16,16,128], index: 3, kind: output, shape index: {}, may-alias: {0,3}]  }
   0x1   :  { %s507_s14 = smov 0   ;;  %s509_s15 = smov 0  }
   0x2   :  { %s511_s16 = smov 0  }
   0x3 LB: > { %s22_s17 = sadd.s32 1, %s473_s14  ;;  %s25_s18 = sadd.s32 1, %s477_s15  ;;  %s481_s16 = sphi %s511_s16, %s13_s16   ;;  %s477_s15 = sphi %s509_s15, %s585_s15   ;;  %s473_s14 = sphi %s507_s14, %s584_s14   ;;  %s469_s13 = sphi %s505_s13, %s583_s13   ;;  %s465_s12 = sphi %s503_s12, %s582_s12  }
   0x4   : > { %p23_p0 = scmp.ge.s32.totalorder %s22_s17, 2  ;;  %p390_p1 = scmp.ge.s32.totalorder %s481_s16, 1 }
   0x5   : > { %p159_p2 = scmp.lt.s32.totalorder %s481_s16, 5 }
   0x6   : > { %s587_s17 = smov (%p23_p0, %s22_s17), 0  ;;  %s589_s18 = smov (!%p23_p0, %s25_s18), %s477_s15 }
   0x7   : > { %p160_p3 = pnand %p390_p1, %p159_p2  ;;  %p27_p4 = scmp.ge.s32.totalorder %s589_s18, 2 }
   0x8   : > { %s391_s19 = sshll.u32 (!%p160_p3), %s465_s12, 3  ;;  %p194_p5 = scmp.lt.s32.totalorder (!%p160_p3), %s469_s13, 1 }
   0x9   : > { %s591_s18 = smov (%p27_p4, %s589_s18), 0  ;;  %163 = sbr.rel (%p160_p3) target bundleno = 41 (0x29), region = 32 }
   0xa   : > { %p196_p6 = scmp.lt.s32.totalorder (!%p160_p3), %s391_s19, 15 }
   0xe   : > { %s593_s13 = smov (!%p194_p5, %s469_s13), 1  ;;  %s595_s19 = smov (!%p196_p6, %s391_s19), 15  ;;  %v441_v0 = vld [vmem:[%s579_s1] ss:$0 sm:$0xff] }
   0xf   : > { %s393_s20 = sshll.u32 %s593_s13, 5  ;;  %s392_s21 = sshll.u32 %s595_s19, 1  ;;  %v442_v1 = vld [vmem:[%s580_s2] ss:$0 sm:$0xff] }
  0x10   : > { %s200_s22 = sadd.s32 %s393_s20, %s392_s21 }
  0x11   : > { %s394_s25 = sshll.u32 %s200_s22, 3 }
  0x12   : > { %s202_s28 = scalar_lea.vmem %s578_s0, %s394_s25  ;;  %s545_s6 = scalar_lea.vmem %s581_s3, %s394_s25 }
  0x13   : > { %v215_v2 = vld [vmem:[%s202_s28] sm:$0xff]  ;;  %v216_v3 = vld [vmem:[%s202_s28 + $0x8] sm:$0xff]  ;;  %v217_v4 = vld [vmem:[%s202_s28 + $0x10] sm:$0xff] }
  0x14   : > { %v218_v5 = vld [vmem:[%s202_s28 + $0x18] sm:$0xff]  ;;  %v219_v6 = vld [vmem:[%s202_s28 + $0x20] sm:$0xff]  ;;  %v220_v7 = vld [vmem:[%s202_s28 + $0x28] sm:$0xff]  ;;  %v235_v8 = vmul.f32 %v441_v0, %v215_v2  ;;  %v236_v9 = vmul.f32 %v441_v0, %v216_v3  ;;  %v237_v10 = vmul.f32 %v441_v0, %v217_v4 }
  0x15   : > { %v221_v11 = vld [vmem:[%s202_s28 + $0x30] sm:$0xff]  ;;  %v222_v12 = vld [vmem:[%s202_s28 + $0x38] sm:$0xff]  ;;  %v238_v13 = vmul.f32 %v441_v0, %v218_v5  ;;  %v239_v14 = vmul.f32 %v441_v0, %v219_v6  ;;  %v223_v15 = vld [vmem:[%s202_s28 + $0x40] sm:$0xff]  ;;  %v240_v17 = vmul.f32 %v441_v0, %v220_v7 }
  0x16   : > { %v224_v16 = vld [vmem:[%s202_s28 + $0x48] sm:$0xff]  ;;  %v255_v18 = vadd.f32 %v442_v1, %v235_v8  ;;  %v225_v19 = vld [vmem:[%s202_s28 + $0x50] sm:$0xff]  ;;  %v226_v20 = vld [vmem:[%s202_s28 + $0x58] sm:$0xff]  ;;  %v241_v22 = vmul.f32 %v441_v0, %v221_v11  ;;  %v256_v23 = vadd.f32 %v442_v1, %v236_v9  ;;  %v242_v27 = vmul.f32 %v441_v0, %v222_v12 }
  0x17   : > { %v227_v21 = vld [vmem:[%s202_s28 + $0x60] sm:$0xff]  ;;  %v228_v24 = vld [vmem:[%s202_s28 + $0x68] sm:$0xff]  ;;  %v229_v25 = vld [vmem:[%s202_s28 + $0x70] sm:$0xff]  ;;  %v257_v28 = vadd.f32 %v442_v1, %v237_v10  ;;  %v243_v29 = vmul.f32 %v441_v0, %v223_v15  ;;  %v258_v30 = vadd.f32 %v442_v1, %v238_v13  ;;  %v259_v31 = vadd.f32 %v442_v1, %v239_v14 }
  0x18   : > { %v230_v26 = vld [vmem:[%s202_s28 + $0x78] sm:$0xff]  ;;  %v244_v32 = vmul.f32 %v441_v0, %v224_v16  ;;  %v260_v33 = vadd.f32 %v442_v1, %v240_v17  ;;  %v245_v34 = vmul.f32 %v441_v0, %v225_v19  ;;  %v261_v35 = vadd.f32 %v442_v1, %v241_v22 }
  0x19   : > { %271 = vst [vmem:[%s545_s6] sm:$0xff] %v255_v18  ;;  %v246_v36 = vmul.f32 %v441_v0, %v226_v20  ;;  %v262_v37 = vadd.f32 %v442_v1, %v242_v27  ;;  %v247_v38 = vmul.f32 %v441_v0, %v227_v21  ;;  %v263_v39 = vadd.f32 %v442_v1, %v243_v29 }
  0x1a   : > { %272 = vst [vmem:[%s545_s6 + $0x8] sm:$0xff] %v256_v23  ;;  %v248_v40 = vmul.f32 %v441_v0, %v228_v24  ;;  %v264_v41 = vadd.f32 %v442_v1, %v244_v32  ;;  %v249_v42 = vmul.f32 %v441_v0, %v229_v25  ;;  %v265_v43 = vadd.f32 %v442_v1, %v245_v34 }
  0x1b   : > { %273 = vst [vmem:[%s545_s6 + $0x10] sm:$0xff] %v257_v28  ;;  %v250_v44 = vmul.f32 %v441_v0, %v230_v26  ;;  %v266_v45 = vadd.f32 %v442_v1, %v246_v36  ;;  %v267_v46 = vadd.f32 %v442_v1, %v247_v38 }
  0x1c   : > { %274 = vst [vmem:[%s545_s6 + $0x18] sm:$0xff] %v258_v30  ;;  %v268_v47 = vadd.f32 %v442_v1, %v248_v40  ;;  %v269_v48 = vadd.f32 %v442_v1, %v249_v42 }
  0x1d   : > { %275 = vst [vmem:[%s545_s6 + $0x20] sm:$0xff] %v259_v31  ;;  %v270_v49 = vadd.f32 %v442_v1, %v250_v44 }
  0x1e   : > { %276 = vst [vmem:[%s545_s6 + $0x28] sm:$0xff] %v260_v33 }
  0x1f   : > { %277 = vst [vmem:[%s545_s6 + $0x30] sm:$0xff] %v261_v35 }
  0x20   : > { %278 = vst [vmem:[%s545_s6 + $0x38] sm:$0xff] %v262_v37 }
  0x21   : > { %279 = vst [vmem:[%s545_s6 + $0x40] sm:$0xff] %v263_v39 }
  0x22   : > { %280 = vst [vmem:[%s545_s6 + $0x48] sm:$0xff] %v264_v41 }
  0x23   : > { %281 = vst [vmem:[%s545_s6 + $0x50] sm:$0xff] %v265_v43 }
  0x24   : > { %282 = vst [vmem:[%s545_s6 + $0x58] sm:$0xff] %v266_v45 }
  0x25   : > { %283 = vst [vmem:[%s545_s6 + $0x60] sm:$0xff] %v267_v46 }
  0x26   : > { %284 = vst [vmem:[%s545_s6 + $0x68] sm:$0xff] %v268_v47 }
  0x27   : > { %285 = vst [vmem:[%s545_s6 + $0x70] sm:$0xff] %v269_v48 }
  0x28   : > { %286 = vst [vmem:[%s545_s6 + $0x78] sm:$0xff] %v270_v49 }
  0x29 PF: > { %s13_s16 = sadd.s32 1, %s481_s16   ;;  %s582_s12 = smov %s473_s14 }
  0x2a   : > { %p10_p7 = scmp.ge.s32.totalorder %s13_s16, 6   ;;  %s583_s13 = smov %s477_s15 }
  0x2b   : > { %s584_s14 = smov %s587_s17  ;;  %s585_s15 = smov %s591_s18 }
  0x2c   :  { %12 = sbr.rel (!%p10_p7) target bundleno = 3 (0x3), region = 62 }

// kernel: aspp_forward.2
= control target key start
LH: loop header
LB: loop body
LE: loop exit
PB: predicated region body
PF: predicated region fallthrough
CT: control target
= control target key end

     0   :  { %s2618_s12 = smov 0   ;;  %s2620_s13 = smov 0   ;;  %s3317_s0 = inlined_call_operand.vmem [shape: bf16[2,20,20,4], index: 0, kind: input, shape index: {}]   ;;  %s3318_s1 = inlined_call_operand.vmem [shape: bf16[9,4,128], index: 1, kind: input, shape index: {}]   ;;  %s3319_s2 = inlined_call_operand.vmem [shape: f32[2,16,16,128], index: 2, kind: output, shape index: {0}]   ;;  %s3320_s3 = inlined_call_operand.vmem [shape: f32[2,2,8,128], index: 3, kind: output, shape index: {1}]  }
   0x1   :  { %s2622_s14 = smov 0   ;;  %s2624_s15 = smov 0  }
   0x2   :  { %s2626_s16 = smov 0  }
   0x3 LB: > { %s23_s17 = sadd.s32 1, %s2588_s14  ;;  %s26_s18 = sadd.s32 1, %s2592_s15  ;;  %s2596_s16 = sphi %s2626_s16, %s14_s16   ;;  %s2592_s15 = sphi %s2624_s15, %s3328_s15   ;;  %s2588_s14 = sphi %s2622_s14, %s3327_s14   ;;  %s2584_s13 = sphi %s2620_s13, %s3326_s13   ;;  %s2580_s12 = sphi %s2618_s12, %s3325_s12  }
   0x4   : > { %p24_p0 = scmp.ge.s32.totalorder %s23_s17, 2  ;;  %p2144_p1 = scmp.ge.s32.totalorder %s2596_s16, 1 }
   0x5   : > { %p156_p2 = scmp.lt.s32.totalorder %s2596_s16, 5 }
   0x6   : > { %s3330_s17 = smov (%p24_p0, %s23_s17), 0  ;;  %s3332_s18 = smov (!%p24_p0, %s26_s18), %s2592_s15 }
   0x7   : > { %p157_p3 = pnand %p2144_p1, %p156_p2  ;;  %p28_p4 = scmp.ge.s32.totalorder %s3332_s18, 2 }
   0x8   : > { %p193_p5 = scmp.lt.s32.totalorder (!%p157_p3), %s2584_s13, 1  ;;  %s2489_s27 = smul.u32 (!%p157_p3), 96, %s2580_s12 }
   0x9   : > { %s3334_s18 = smov (%p28_p4, %s3332_s18), 0  ;;  %160 = sbr.rel (%p157_p3) target bundleno = 468 (0x1d4), region = 28 }
   0xa   : > { %s2146_s23 = sshll.u32 (!%p157_p3), %s2580_s12, 3  ;;  %p211_p7 = scmp.lt.s32.totalorder (!%p157_p3), %s2580_s12, 1 }
   0xb   : > { %p201_p6 = scmp.lt.s32.totalorder (!%p157_p3), %s2146_s23, 15 }
   0xe   : > { %v220_v0 = vld [vmem:[%s3318_s1 + $0x2] sm:$0x3]  ;;  %vm395_vm0 = vcmask 1041408   ;;  %v221_v2 = vld [vmem:[%s3318_s1 + $0x4] sm:$0x3]  ;;  %s3336_s13 = smov (!%p193_p5, %s2584_s13), 1 }
   0xf   : > { %v397_v1 = vsel %vm395_vm0, %v220_v0, 0  ;;  %v696_v3 = vsel %vm395_vm0, %v221_v2, 0  ;;  %v222_v4 = vld [vmem:[%s3318_s1 + $0x6] sm:$0x3]  ;;  %v219_v5 = vld [vmem:[%s3318_s1] sm:$0x3] }
  0x10   : > { %2514 = vmatpush.bf16.msra.mxu1 %v397_v1  ;;  %2515 = vmatpush.bf16.msra.mxu2 %v397_v1  ;;  %v848_v6 = vsel %vm395_vm0, %v222_v4, 0  ;;  %v505_v7 = vsel %vm395_vm0, %v219_v5, 0  ;;  %v223_v8 = vld [vmem:[%s3318_s1 + $0x8] sm:$0x3]  ;;  %s2517_s30 = smul.u32 240, %s3336_s13  ;;  %vm287_vm1 = vcmask 1042432  }
  0x11   : > { %2516 = vmatpush.bf16.msra.mxu3 %v397_v1  ;;  %406 = vmatpush.bf16.msra.mxu0 %v397_v1  ;;  %vm288_vm2 = vcmask 1046532   ;;  %v1068_v9 = vsel %vm395_vm0, %v223_v8, 0  ;;  %vm370_vm4 = vcmask 31744   ;;  %vm589_vm5 = vcmask 1045508   ;;  %s3338_s23 = smov (!%p201_p6, %s2146_s23), 15  ;;  %s2148_s25 = sshll.u32 %s3336_s13, 5 }
  0x12   : > { %s197_s6 = scalar_lea.vmem %s3317_s0, %s2517_s30  ;;  %vm2679_vm3 = vmor %vm287_vm1, %vm288_vm2  ;;  %s2147_s24 = sshll.u32 %s3338_s23, 1  ;;  %vm1989_vm7 = vcmask 1040384  }
  0x13   : > { %s2677_s7 = scalar_lea.vmem %s197_s6, %s2489_s27  ;;  %vm2792_vm6 = vmor %vm395_vm0, %vm589_vm5  ;;  %s205_s26 = sadd.s32 %s2148_s25, %s2147_s24 }
  0x14   : > { %705 = vmatpush.bf16.msrb.mxu2 %v696_v3  ;;  %514 = vmatpush.bf16.msrb.mxu1 %v505_v7  ;;  %v2684_v11 = vld [vmem:[%s2677_s7 + $0x1c] sm:$0xf]  ;;  %v251_v12 = vld [vmem:[%s2677_s7 + $0x18] sm:$0xe]  ;;  %v252_v13 = vld [vmem:[%s2677_s7 + $0x20] sm:$0x1] }
  0x15   : > { %857 = vmatpush.bf16.msrb.mxu3 %v848_v6  ;;  %1077 = vmatpush.bf16.msrb.mxu0 %v1068_v9  ;;  %v2157_v14 = vrot.slane %v251_v12, 9  ;;  %v306_v15 = vrot.slane %v2684_v11, 5  ;;  %v309_v16 = vrot.slane %v252_v13, 5  ;;  %v2690_v17 = vld [vmem:[%s2677_s7 + $0x34] sm:$0xf]  ;;  %v2513_v10 = vld [vmem:[%s2677_s7 + $0x84] sm:$0xff] }
  0x16   : > { %v255_v18 = vld [vmem:[%s2677_s7 + $0x30] sm:$0xe]  ;;  %v256_v19 = vld [vmem:[%s2677_s7 + $0x38] sm:$0x1]  ;;  %v320_v20 = vrot.slane %v2690_v17, 5  ;;  %s2149_s27 = sshll.u32 %s205_s26, 3 }
  0x17   : > { %v307_v21 = vsel %vm2679_vm3, %v2157_v14, %v306_v15  ;;  %v308_v22 = vrot.slane %v306_v15, 4  ;;  %v2159_v23 = vrot.slane %v255_v18, 9  ;;  %v323_v24 = vrot.slane %v256_v19, 5  ;;  %v2698_v25 = vld [vmem:[%s2677_s7 + $0x4c] sm:$0xf]  ;;  %s3262_s30 = scalar_lea.vmem %s3319_s2, %s2149_s27  ;;  %s3340_s12 = smov (!%p211_p7, %s2580_s12), 1 }
  0x18   : > { %v350_v26 = vunpack.c.l.b16 %v307_v21  ;;  %v322_v27 = vrot.slane %v320_v20, 4  ;;  %v259_v28 = vld [vmem:[%s2677_s7 + $0x48] sm:$0xe]  ;;  %v260_v29 = vld [vmem:[%s2677_s7 + $0x50] sm:$0x1]  ;;  %v334_v30 = vrot.slane %v2698_v25, 5 }
  0x19   : > { %v310_v31 = vsel %vm2679_vm3, %v308_v22, %v309_v16  ;;  %v321_v32 = vsel %vm2679_vm3, %v2159_v23, %v320_v20  ;;  %v2161_v33 = vrot.slane %v259_v28, 9  ;;  %v337_v34 = vrot.slane %v260_v29, 5  ;;  %v2708_v35 = vld [vmem:[%s2677_s7 + $0x4] sm:$0xf]  ;;  %v247_v36 = vld [vmem:[%s2677_s7] sm:$0xe] }
  0x1a   : > { %v351_v37 = vunpack.c.l.b16 %v310_v31  ;;  %v324_v38 = vsel %vm2679_vm3, %v322_v27, %v323_v24  ;;  %v354_v39 = vunpack.c.l.b16 %v321_v32  ;;  %v336_v40 = vrot.slane %v334_v30, 4  ;;  %v248_v41 = vld [vmem:[%s2677_s7 + $0x8] sm:$0x1]  ;;  %v253_v51 = vld [vmem:[%s2677_s7 + $0x24] sm:$0xe]  ;;  %s2150_s4 = sshll.u32 %s3336_s13, 1 }
  0x1b   : > { %v355_v42 = vunpack.c.l.b16 %v324_v38  ;;  %v335_v43 = vsel %vm2679_vm3, %v2161_v33, %v334_v30  ;;  %v2155_v44 = vrot.slane %v247_v36, 9  ;;  %v292_v45 = vrot.slane %v2708_v35, 5  ;;  %v2718_v46 = vld [vmem:[%s2677_s7 + $0x28] sm:$0xf]  ;;  %v254_v52 = vld [vmem:[%s2677_s7 + $0x2c] sm:$0x1]  ;;  %s214_s5 = sadd.s32 %s2150_s4, %s3340_s12 }
  0x1c   : > { %v364_v47 = vpack.c.b16 %v351_v37, %v350_v26  ;;  %v338_v48 = vsel %vm2679_vm3, %v336_v40, %v337_v34  ;;  %v358_v49 = vunpack.c.l.b16 %v335_v43  ;;  %v295_v50 = vrot.slane %v248_v41, 5  ;;  %v2727_v57 = vld [vmem:[%s2677_s7 + $0x40] sm:$0xf]  ;;  %v257_v58 = vld [vmem:[%s2677_s7 + $0x3c] sm:$0xe]  ;;  %s2151_s6 = sshll.u32 %s214_s5, 3 }
  0x1d   : > { %v366_v53 = vpack.c.b16 %v355_v42, %v354_v39  ;;  %v359_v54 = vunpack.c.l.b16 %v338_v48  ;;  %v293_v55 = vsel %vm2679_vm3, %v2155_v44, %v292_v45  ;;  %v294_v56 = vrot.slane %v292_v45, 4  ;;  %v258_v61 = vld [vmem:[%s2677_s7 + $0x44] sm:$0x1]  ;;  %v2734_v62 = vld [vmem:[%s2677_s7 + $0x58] sm:$0xf]  ;;  %s216_s9 = scalar_lea.vmem %s3320_s3, %s2151_s6 }
  0x1e   : > { %2165 = vmatmul.msk.bf16.vlgmr.msra.gmra.mxu1 %vm370_vm4, %v364_v47  ;;  %v346_v59 = vunpack.c.l.b16 %v293_v55  ;;  %v313_v60 = vrot.slane %v2718_v46, 5  ;;  %v2158_v1 = vrot.slane %v253_v51, 9  ;;  %v316_v2 = vrot.slane %v254_v52, 5  ;;  %v261_v3 = vld [vmem:[%s2677_s7 + $0x54] sm:$0xe] }
  0x1f   : > { %2167 = vmatmul.msk.bf16.vlgmr.msra.gmra.mxu2 %vm370_vm4, %v366_v53  ;;  %v368_v63 = vpack.c.b16 %v359_v54, %v358_v49  ;;  %v296_v0 = vsel %vm2679_vm3, %v294_v56, %v295_v50  ;;  %v2160_v6 = vrot.slane %v257_v58, 9  ;;  %v327_v7 = vrot.slane %v2727_v57, 5  ;;  %v262_v9 = vld [vmem:[%s2677_s7 + $0x5c] sm:$0x1]  ;;  %v2745_v13 = vld [vmem:[%s2677_s7 + $0x10] sm:$0xf] }
  0x20   : > { %v347_v4 = vunpack.c.l.b16 %v296_v0  ;;  %v315_v5 = vrot.slane %v313_v60, 4  ;;  %v330_v8 = vrot.slane %v258_v61, 5  ;;  %v341_v12 = vrot.slane %v2734_v62, 5  ;;  %v249_v18 = vld [vmem:[%s2677_s7 + $0xc] sm:$0xe] }
  0x21   : > { %2169 = vmatmul.msk.bf16.vlgmr.msra.gmra.mxu3 %vm370_vm4, %v368_v63  ;;  %v329_v15 = vrot.slane %v327_v7, 4  ;;  %v2162_v16 = vrot.slane %v261_v3, 9  ;;  %v250_v19 = vld [vmem:[%s2677_s7 + $0x14] sm:$0x1]  ;;  %v314_v20 = vsel %vm2679_vm3, %v2158_v1, %v313_v60  ;;  %v328_v23 = vsel %vm2679_vm3, %v2160_v6, %v327_v7  ;;  %v225_v30 = vld [vmem:[%s3318_s1 + $0xc] sm:$0x3] }
  0x22   : > { %v362_v14 = vpack.c.b16 %v347_v4, %v346_v59  ;;  %v317_v21 = vsel %vm2679_vm3, %v315_v5, %v316_v2  ;;  %v343_v22 = vrot.slane %v341_v12, 4  ;;  %v344_v26 = vrot.slane %v262_v9, 5  ;;  %v226_v40 = vld [vmem:[%s3318_s1 + $0xe] sm:$0x3]  ;;  %v224_v41 = vld [vmem:[%s3318_s1 + $0xa] sm:$0x3] }
  0x23   : > { %v331_v24 = vsel %vm2679_vm3, %v329_v15, %v330_v8  ;;  %v2156_v27 = vrot.slane %v249_v18, 9  ;;  %v299_v28 = vrot.slane %v2745_v13, 5  ;;  %v302_v29 = vrot.slane %v250_v19, 5  ;;  %v227_v47 = vld [vmem:[%s3318_s1 + $0x10] sm:$0x3]  ;;  %v2490_v18 = vld [vmem:[%s2677_s7] sm:$0xff] }
  0x24   : > { %2163 = vmatmul.msk.bf16.vlgmr.msra.gmra.mxu0 %vm370_vm4, %v362_v14  ;;  %v352_v31 = vunpack.c.l.b16 %v314_v20  ;;  %v353_v32 = vunpack.c.l.b16 %v317_v21  ;;  %v342_v33 = vsel %vm2679_vm3, %v2162_v16, %v341_v12  ;;  %v345_v34 = vsel %vm2679_vm3, %v343_v22, %v344_v26  ;;  %v556_v58 = vld [vmem:[%s2677_s7] sm:$0xc]  ;;  %v557_v59 = vld [vmem:[%s2677_s7 + $0x8] sm:$0x3]  ;;  %v2788_v60 = vld [vmem:[%s2677_s7 + $0x1c] sm:$0xf] }
  0x25   : > { %v356_v36 = vunpack.c.l.b16 %v328_v23  ;;  %v357_v37 = vunpack.c.l.b16 %v331_v24  ;;  %v301_v38 = vrot.slane %v299_v28, 4  ;;  %v1424_v39 = vsel %vm395_vm0, %v225_v30, 0  ;;  %v2285_v3 = vld [vmem:[%s2677_s7 + $0x18] sm:$0xe]  ;;  %v2287_v4 = vld [vmem:[%s2677_s7 + $0x20] sm:$0x1] }
  0x26   : > { %v360_v42 = vunpack.c.l.b16 %v342_v33  ;;  %v361_v43 = vunpack.c.l.b16 %v345_v34  ;;  %v300_v44 = vsel %vm2679_vm3, %v2156_v27, %v299_v28  ;;  %1433 = vmatpush.bf16.msra.mxu2 %v1424_v39  ;;  %v365_v48 = vpack.c.b16 %v353_v32, %v352_v31  ;;  %v2498_v23 = vld [vmem:[%s2677_s7 + $0x18] sm:$0xff]  ;;  %v558_v24 = vld [vmem:[%s2677_s7 + $0xc] sm:$0xc]  ;;  %v559_v26 = vld [vmem:[%s2677_s7 + $0x14] sm:$0x3] }
  0x27   : > { %v303_v45 = vsel %vm2679_vm3, %v301_v38, %v302_v29  ;;  %v367_v49 = vpack.c.b16 %v357_v37, %v356_v36  ;;  %v1644_v50 = vsel %vm395_vm0, %v226_v40, 0  ;;  %v1272_v51 = vsel %vm395_vm0, %v224_v41, 0  ;;  %v2816_v27 = vld [vmem:[%s2677_s7 + $0x28] sm:$0xf]  ;;  %v2288_v33 = vld [vmem:[%s2677_s7 + $0x24] sm:$0xe] }
  0x28   : > { %v593_v52 = vrot.slane %v2708_v35, 6  ;;  %v348_v53 = vunpack.c.l.b16 %v300_v44  ;;  %v349_v54 = vunpack.c.l.b16 %v303_v45  ;;  %1653 = vmatpush.bf16.msra.mxu3 %v1644_v50  ;;  %1281 = vmatpush.bf16.msra.mxu1 %v1272_v51  ;;  %v1848_v55 = vsel %vm395_vm0, %v227_v47, 0  ;;  %v2491_v44 = vld [vmem:[%s2677_s7 + $0xc] sm:$0xff]  ;;  %v2499_v50 = vld [vmem:[%s2677_s7 + $0x24] sm:$0xff]  ;;  %v560_v51 = vld [vmem:[%s2677_s7 + $0x18] sm:$0xc] }
  0x29   : > { %v369_v56 = vpack.c.b16 %v361_v43, %v360_v42  ;;  %1857 = vmatpush.bf16.msra.mxu0 %v1848_v55  ;;  %v2211_v61 = vrot.slane %v556_v58, 10  ;;  %v596_v0 = vrot.slane %v557_v59, 6  ;;  %v965_v2 = vrot.slane %v2788_v60, 5 }
  0x2a   : > { %v363_v35 = vpack.c.b16 %v349_v54, %v348_v53  ;;  %v595_v63 = vrot.slane %v593_v52, 4  ;;  %v2309_v7 = vrot.slane %v2285_v3, 9  ;;  %v968_v9 = vrot.slane %v2287_v4, 5  ;;  %v2839_v53 = vld [vmem:[%s2677_s7 + $0x34] sm:$0xf] }
  0x2b   : > { %v594_v5 = vsel %vm2792_vm6, %v2211_v61, %v593_v52  ;;  %v967_v8 = vrot.slane %v965_v2, 4  ;;  %v600_v22 = vrot.slane %v2745_v13, 6  ;;  %v2212_v29 = vrot.slane %v558_v24, 10  ;;  %v2290_v13 = vld [vmem:[%s2677_s7 + $0x2c] sm:$0x1] }
  0x2c   : > { %v597_v6 = vsel %vm2792_vm6, %v595_v63, %v596_v0  ;;  %v647_v12 = vunpack.c.l.b16 %v594_v5  ;;  %v966_v15 = vsel %vm2679_vm3, %v2309_v7, %v965_v2  ;;  %v603_v31 = vrot.slane %v559_v26, 6  ;;  %v561_v52 = vld [vmem:[%s2677_s7 + $0x20] sm:$0x3] }
  0x2d   : > { %v648_v14 = vunpack.c.l.b16 %v597_v6  ;;  %v969_v16 = vsel %vm2679_vm3, %v967_v8, %v968_v9  ;;  %v1019_v20 = vunpack.c.l.b16 %v966_v15  ;;  %v602_v30 = vrot.slane %v600_v22, 4  ;;  %v2492_v8 = vld [vmem:[%s2677_s7 + $0x18] sm:$0xff] }
  0x2e   : > { %2166 = vmatmul.msk.bf16.gmra.mxu1 %vm370_vm4, %v365_v48  ;;  %v1020_v21 = vunpack.c.l.b16 %v969_v16  ;;  %v972_v32 = vrot.slane %v2816_v27, 5  ;;  %v601_v34 = vsel %vm2792_vm6, %v2212_v29, %v600_v22  ;;  %v2310_v37 = vrot.slane %v2288_v33, 9  ;;  %v2500_v16 = vld [vmem:[%s2677_s7 + $0x30] sm:$0xff] }
  0x2f   : > { %2168 = vmatmul.msk.bf16.gmra.mxu2 %vm370_vm4, %v367_v49  ;;  %v663_v19 = vpack.c.b16 %v648_v14, %v647_v12  ;;  %v604_v36 = vsel %vm2792_vm6, %v602_v30, %v603_v31  ;;  %v975_v39 = vrot.slane %v2290_v13, 5  ;;  %v649_v40 = vunpack.c.l.b16 %v601_v34 }
  0x30   : > { %v1035_v28 = vpack.c.b16 %v1020_v21, %v1019_v20  ;;  %v974_v38 = vrot.slane %v972_v32, 4  ;;  %v650_v41 = vunpack.c.l.b16 %v604_v36  ;;  %v973_v42 = vsel %vm2679_vm3, %v2310_v37, %v972_v32  ;;  %v2862_v20 = vld [vmem:[%s2677_s7 + $0x40] sm:$0xf] }
  0x31   : > { %2170 = vmatmul.msk.bf16.gmra.mxu3 %vm370_vm4, %v369_v56  ;;  %v1021_v47 = vunpack.c.l.b16 %v973_v42  ;;  %v607_v49 = vrot.slane %v2684_v11, 6  ;;  %v2213_v55 = vrot.slane %v560_v51, 10  ;;  %v610_v58 = vrot.slane %v561_v52, 6  ;;  %v2293_v11 = vld [vmem:[%s2677_s7 + $0x38] sm:$0x1] }
  0x32   : > { %v976_v43 = vsel %vm2679_vm3, %v974_v38, %v975_v39  ;;  %v664_v45 = vpack.c.b16 %v650_v41, %v649_v40  ;;  %v979_v59 = vrot.slane %v2839_v53, 5  ;;  %v982_v3 = vrot.slane %v2293_v11, 5  ;;  %v2493_v38 = vld [vmem:[%s2677_s7 + $0x24] sm:$0xff] }
  0x33   : > { %v1022_v48 = vunpack.c.l.b16 %v976_v43  ;;  %v609_v56 = vrot.slane %v607_v49, 4  ;;  %v608_v61 = vsel %vm2792_vm6, %v2213_v55, %v607_v49  ;;  %v614_v15 = vrot.slane %v2718_v46, 6  ;;  %v2296_v46 = vld [vmem:[%s2677_s7 + $0x44] sm:$0x1]  ;;  %v2501_v43 = vld [vmem:[%s2677_s7 + $0x3c] sm:$0xff] }
  0x34   : > { %2164 = vmatmul.msk.bf16.gmra.mxu0 %vm370_vm4, %v363_v35  ;;  %v2291_v35 = vld [vmem:[%s2677_s7 + $0x30] sm:$0xe]  ;;  %v981_v2 = vrot.slane %v979_v59, 4  ;;  %v651_v4 = vunpack.c.l.b16 %v608_v61  ;;  %v986_v26 = vrot.slane %v2862_v20, 5  ;;  %v989_v33 = vrot.slane %v2296_v46, 5 }
  0x35   : > { %v1036_v54 = vpack.c.b16 %v1022_v48, %v1021_v47  ;;  %v611_v63 = vsel %vm2792_vm6, %v609_v56, %v610_v58  ;;  %v2311_v0 = vrot.slane %v2291_v35, 9  ;;  %v621_v42 = vrot.slane %v2690_v17, 6  ;;  %v2885_v47 = vld [vmem:[%s2677_s7 + $0x4c] sm:$0xf]  ;;  %v2299_v17 = vld [vmem:[%s2677_s7 + $0x50] sm:$0x1] }
  0x36   : > { %v652_v5 = vunpack.c.l.b16 %v611_v63  ;;  %v983_v7 = vsel %vm2679_vm3, %v981_v2, %v982_v3  ;;  %v988_v32 = vrot.slane %v986_v26, 4  ;;  %v993_v52 = vrot.slane %v2885_v47, 5  ;;  %v2494_v2 = vld [vmem:[%s2677_s7 + $0x30] sm:$0xff] }
  0x37   : > { %v980_v6 = vsel %vm2679_vm3, %v2311_v0, %v979_v59  ;;  %v1024_v14 = vunpack.c.l.b16 %v983_v7  ;;  %v996_v35 = vrot.slane %v2299_v17, 5  ;;  %v2502_v7 = vld [vmem:[%s2677_s7 + $0x48] sm:$0xff] }
  0x38   : > { %v665_v9 = vpack.c.b16 %v652_v5, %v651_v4  ;;  %v1023_v12 = vunpack.c.l.b16 %v980_v6  ;;  %v990_v37 = vsel %vm2679_vm3, %v988_v32, %v989_v33  ;;  %v995_v59 = vrot.slane %v993_v52, 4  ;;  %v2495_v32 = vld [vmem:[%s2677_s7 + $0x3c] sm:$0xff] }
  0x39   : > { %v1026_v41 = vunpack.c.l.b16 %v990_v37  ;;  %v628_v6 = vrot.slane %v2727_v57, 6  ;;  %v2302_v57 = vld [vmem:[%s2677_s7 + $0x5c] sm:$0x1]  ;;  %v2503_v37 = vld [vmem:[%s2677_s7 + $0x54] sm:$0xff] }
  0x3a   : > { %v1037_v21 = vpack.c.b16 %v1024_v14, %v1023_v12  ;;  %v997_v0 = vsel %vm2679_vm3, %v995_v59, %v996_v35  ;;  %v2908_v12 = vld [vmem:[%s2677_s7 + $0x58] sm:$0xf]  ;;  %v2496_v59 = vld [vmem:[%s2677_s7 + $0x48] sm:$0xff] }
  0x3b   : > { %v1028_v5 = vunpack.c.l.b16 %v997_v0  ;;  %v642_v0 = vrot.slane %v2734_v62, 6 }
  0x3e   : > { %2203 = vmatmul.msk.bf16.vlgmr.msrb.gmra.mxu1 %vm370_vm4, %v2490_v18  ;;  %v562_v18 = vld [vmem:[%s2677_s7 + $0x24] sm:$0xc] }
  0x3f   : > { %2219 = vmatmul.msk.bf16.vlgmr.msrb.gmra.mxu2 %vm370_vm4, %v663_v19  ;;  %v563_v19 = vld [vmem:[%s2677_s7 + $0x2c] sm:$0x3]  ;;  %v2214_v22 = vrot.slane %v562_v18, 10 }
  0x40   : > { %v617_v24 = vrot.slane %v563_v19, 6  ;;  %v1000_v19 = vrot.slane %v2908_v12, 5 }
  0x41   : > { %2277 = vmatmul.msk.bf16.vlgmr.msrb.gmra.mxu3 %vm370_vm4, %v2498_v23  ;;  %v616_v23 = vrot.slane %v614_v15, 4  ;;  %v615_v29 = vsel %vm2792_vm6, %v2214_v22, %v614_v15 }
  0x42   : > { %v653_v13 = vunpack.c.l.b16 %v615_v29 }
  0x43   : > { %v618_v30 = vsel %vm2792_vm6, %v616_v23, %v617_v24 }
  0x44   : > { %2317 = vmatmul.msk.bf16.vlgmr.msrb.gmra.mxu0 %vm370_vm4, %v1035_v28  ;;  %v2294_v28 = vld [vmem:[%s2677_s7 + $0x3c] sm:$0xe]  ;;  %v654_v34 = vunpack.c.l.b16 %v618_v30 }
  0x45   : > { %v2312_v31 = vrot.slane %v2294_v28, 9  ;;  %v1003_v28 = vrot.slane %v2302_v57, 5 }
  0x46   : > { %v666_v39 = vpack.c.b16 %v654_v34, %v653_v13 }
  0x47   : > { %v987_v36 = vsel %vm2679_vm3, %v2312_v31, %v986_v26  ;;  %v1002_v26 = vrot.slane %v1000_v19, 4 }
  0x48   : > { %v1025_v40 = vunpack.c.l.b16 %v987_v36  ;;  %v635_v36 = vrot.slane %v2698_v25, 6  ;;  %v2305_v25 = vld [vmem:[%s2677_s7 + $0x68] sm:$0x1] }
  0x49   : > { %v1004_v31 = vsel %vm2679_vm3, %v1002_v26, %v1003_v28 }
  0x4a   : > { %v1038_v48 = vpack.c.b16 %v1026_v41, %v1025_v40  ;;  %v1030_v34 = vunpack.c.l.b16 %v1004_v31  ;;  %v2931_v40 = vld [vmem:[%s2677_s7 + $0x64] sm:$0xf] }
  0x4e   : > { %2204 = vmatmul.msk.bf16.gmra.mxu1 %vm370_vm4, %v2491_v44  ;;  %v564_v44 = vld [vmem:[%s2677_s7 + $0x30] sm:$0xc] }
  0x4f   : > { %2220 = vmatmul.msk.bf16.gmra.mxu2 %vm370_vm4, %v664_v45  ;;  %v565_v45 = vld [vmem:[%s2677_s7 + $0x38] sm:$0x3]  ;;  %v2215_v49 = vrot.slane %v564_v44, 10 }
  0x50   : > { %v624_v51 = vrot.slane %v565_v45, 6  ;;  %v1007_v45 = vrot.slane %v2931_v40, 5 }
  0x51   : > { %2278 = vmatmul.msk.bf16.gmra.mxu3 %vm370_vm4, %v2499_v50  ;;  %v623_v50 = vrot.slane %v621_v42, 4  ;;  %v622_v55 = vsel %vm2792_vm6, %v2215_v49, %v621_v42 }
  0x52   : > { %v655_v11 = vunpack.c.l.b16 %v622_v55 }
  0x53   : > { %v625_v56 = vsel %vm2792_vm6, %v623_v50, %v624_v51 }
  0x54   : > { %2318 = vmatmul.msk.bf16.gmra.mxu0 %vm370_vm4, %v1036_v54  ;;  %v2297_v54 = vld [vmem:[%s2677_s7 + $0x48] sm:$0xe]  ;;  %v656_v61 = vunpack.c.l.b16 %v625_v56 }
  0x55   : > { %v2313_v58 = vrot.slane %v2297_v54, 9  ;;  %v1010_v54 = vrot.slane %v2305_v25, 5 }
  0x56   : > { %v667_v3 = vpack.c.b16 %v656_v61, %v655_v11 }
  0x57   : > { %v994_v63 = vsel %vm2679_vm3, %v2313_v58, %v993_v52  ;;  %v1009_v52 = vrot.slane %v1007_v45, 4 }
  0x58   : > { %v1027_v4 = vunpack.c.l.b16 %v994_v63 }
  0x59   : > { %v1011_v58 = vsel %vm2679_vm3, %v1009_v52, %v1010_v54 }
  0x5a   : > { %v1039_v14 = vpack.c.b16 %v1028_v5, %v1027_v4  ;;  %v1032_v63 = vunpack.c.l.b16 %v1011_v58  ;;  %v571_v4 = vld [vmem:[%s2677_s7 + $0x5c] sm:$0x3]  ;;  %v2956_v5 = vld [vmem:[%s2677_s7 + $0x70] sm:$0xf] }
  0x5b   : > { %v1014_v62 = vrot.slane %v2956_v5, 5 }
  0x5e   : > { %2205 = vmatmul.msk.bf16.gmra.mxu1 %vm370_vm4, %v2492_v8  ;;  %v566_v8 = vld [vmem:[%s2677_s7 + $0x3c] sm:$0xc] }
  0x5f   : > { %2221 = vmatmul.msk.bf16.gmra.mxu2 %vm370_vm4, %v665_v9  ;;  %v567_v9 = vld [vmem:[%s2677_s7 + $0x44] sm:$0x3]  ;;  %v2216_v15 = vrot.slane %v566_v8, 10  ;;  %v644_v8 = vrot.slane %v642_v0, 4 }
  0x60   : > { %v631_v18 = vrot.slane %v567_v9, 6  ;;  %v645_v9 = vrot.slane %v571_v4, 6 }
  0x61   : > { %2279 = vmatmul.msk.bf16.gmra.mxu3 %vm370_vm4, %v2500_v16  ;;  %v630_v16 = vrot.slane %v628_v6, 4  ;;  %v629_v22 = vsel %vm2792_vm6, %v2216_v15, %v628_v6 }
  0x62   : > { %v657_v46 = vunpack.c.l.b16 %v629_v22  ;;  %v646_v22 = vsel %vm2792_vm6, %v644_v8, %v645_v9 }
  0x63   : > { %v632_v23 = vsel %vm2792_vm6, %v630_v16, %v631_v18  ;;  %v2306_v16 = vld [vmem:[%s2677_s7 + $0x6c] sm:$0xe]  ;;  %v2308_v18 = vld [vmem:[%s2677_s7 + $0x74] sm:$0x1] }
  0x64   : > { %2319 = vmatmul.msk.bf16.gmra.mxu0 %vm370_vm4, %v1037_v21  ;;  %v2300_v21 = vld [vmem:[%s2677_s7 + $0x54] sm:$0xe]  ;;  %v658_v29 = vunpack.c.l.b16 %v632_v23  ;;  %v2316_v23 = vrot.slane %v2306_v16, 9  ;;  %v1017_v26 = vrot.slane %v2308_v18, 5 }
  0x65   : > { %v2314_v24 = vrot.slane %v2300_v21, 9 }
  0x66   : > { %v668_v33 = vpack.c.b16 %v658_v29, %v657_v46  ;;  %v662_v46 = vunpack.c.l.b16 %v646_v22 }
  0x67   : > { %v1001_v30 = vsel %vm2679_vm3, %v2314_v24, %v1000_v19  ;;  %v1016_v24 = vrot.slane %v1014_v62, 4 }
  0x68   : > { %v1029_v13 = vunpack.c.l.b16 %v1001_v30  ;;  %v1015_v30 = vsel %vm2679_vm3, %v2316_v23, %v1014_v62 }
  0x69   : > { %v1018_v31 = vsel %vm2679_vm3, %v1016_v24, %v1017_v26 }
  0x6a   : > { %v1040_v41 = vpack.c.b16 %v1030_v34, %v1029_v13  ;;  %v1169_v13 = vrot.slane %v2788_v60, 6 }
  0x6c   : > { %v1171_v25 = vrot.slane %v1169_v13, 4 }
  0x6e   : > { %2206 = vmatmul.msk.bf16.gmra.mxu1 %vm370_vm4, %v2493_v38  ;;  %v568_v38 = vld [vmem:[%s2677_s7 + $0x48] sm:$0xc] }
  0x6f   : > { %2222 = vmatmul.msk.bf16.gmra.mxu2 %vm370_vm4, %v666_v39  ;;  %v569_v39 = vld [vmem:[%s2677_s7 + $0x50] sm:$0x3]  ;;  %v2217_v42 = vrot.slane %v568_v38, 10 }
  0x70   : > { %v638_v44 = vrot.slane %v569_v39, 6  ;;  %v1033_v39 = vunpack.c.l.b16 %v1015_v30  ;;  %v1176_v30 = vrot.slane %v2816_v27, 6 }
  0x71   : > { %2280 = vmatmul.msk.bf16.gmra.mxu3 %vm370_vm4, %v2501_v43  ;;  %v637_v43 = vrot.slane %v635_v36, 4  ;;  %v636_v49 = vsel %vm2792_vm6, %v2217_v42, %v635_v36  ;;  %v2325_v42 = vld [vmem:[%s2677_s7 + $0x18] sm:$0xc] }
  0x72   : > { %v659_v17 = vunpack.c.l.b16 %v636_v49  ;;  %v2341_v60 = vrot.slane %v2325_v42, 10 }
  0x73   : > { %v639_v50 = vsel %vm2792_vm6, %v637_v43, %v638_v44  ;;  %v2326_v43 = vld [vmem:[%s2677_s7 + $0x20] sm:$0x3]  ;;  %v2505_v44 = vld [vmem:[%s2677_s7 + $0x6c] sm:$0xff] }
  0x74   : > { %2320 = vmatmul.msk.bf16.gmra.mxu0 %vm370_vm4, %v1038_v48  ;;  %v2303_v48 = vld [vmem:[%s2677_s7 + $0x60] sm:$0xe]  ;;  %v660_v55 = vunpack.c.l.b16 %v639_v50  ;;  %v1172_v49 = vrot.slane %v2326_v43, 6  ;;  %v2417_v50 = vld [vmem:[%s2677_s7 + $0x38] sm:$0x1] }
  0x75   : > { %v2315_v51 = vrot.slane %v2303_v48, 9  ;;  %v1544_v58 = vrot.slane %v2417_v50, 5  ;;  %v2418_v43 = vld [vmem:[%s2677_s7 + $0x3c] sm:$0xe] }
  0x76   : > { %v669_v11 = vpack.c.b16 %v660_v55, %v659_v17 }
  0x77   : > { %v1008_v56 = vsel %vm2679_vm3, %v2315_v51, %v1007_v45  ;;  %v2415_v45 = vld [vmem:[%s2677_s7 + $0x30] sm:$0xe] }
  0x78   : > { %v1031_v61 = vunpack.c.l.b16 %v1008_v56  ;;  %v2439_v54 = vrot.slane %v2415_v45, 9  ;;  %v1178_v45 = vrot.slane %v1176_v30, 4 }
  0x7a   : > { %v1041_v6 = vpack.c.b16 %v1032_v63, %v1031_v61  ;;  %v1170_v63 = vsel %vm2792_vm6, %v2341_v60, %v1169_v13 }
  0x7e   : > { %2207 = vmatmul.msk.bf16.gmra.mxu1 %vm370_vm4, %v2494_v2  ;;  %v2504_v2 = vld [vmem:[%s2677_s7 + $0x60] sm:$0xff] }
  0x7f   : > { %2223 = vmatmul.msk.bf16.gmra.mxu2 %vm370_vm4, %v667_v3  ;;  %v570_v3 = vld [vmem:[%s2677_s7 + $0x54] sm:$0xc] }
  0x81   : > { %2281 = vmatmul.msk.bf16.gmra.mxu3 %vm370_vm4, %v2502_v7  ;;  %v2218_v7 = vrot.slane %v570_v3, 10 }
  0x83   : > { %v643_v57 = vsel %vm2792_vm6, %v2218_v7, %v642_v0  ;;  %v1173_v0 = vsel %vm2792_vm6, %v1171_v25, %v1172_v49  ;;  %v1223_v7 = vunpack.c.l.b16 %v1170_v63  ;;  %v2420_v25 = vld [vmem:[%s2677_s7 + $0x44] sm:$0x1] }
  0x84   : > { %2321 = vmatmul.msk.bf16.gmra.mxu0 %vm370_vm4, %v1039_v14  ;;  %v661_v28 = vunpack.c.l.b16 %v643_v57  ;;  %v1224_v8 = vunpack.c.l.b16 %v1173_v0 }
  0x86   : > { %v670_v36 = vpack.c.b16 %v662_v46, %v661_v28  ;;  %v1239_v26 = vpack.c.b16 %v1224_v8, %v1223_v7  ;;  %v2506_v46 = vld [vmem:[%s2677_s7 + $0x30] sm:$0xff] }
  0x8e   : > { %2208 = vmatmul.msk.bf16.gmra.mxu1 %vm370_vm4, %v2495_v32 }
  0x8f   : > { %2224 = vmatmul.msk.bf16.gmra.mxu2 %vm370_vm4, %v668_v33  ;;  %v2497_v33 = vld [vmem:[%s2677_s7 + $0x54] sm:$0xff] }
  0x91   : > { %2282 = vmatmul.msk.bf16.gmra.mxu3 %vm370_vm4, %v2503_v37  ;;  %v2416_v37 = vld [vmem:[%s2677_s7 + $0x34] sm:$0xf] }
  0x92   : > { %v1541_v48 = vrot.slane %v2416_v37, 5  ;;  %v1745_v17 = vrot.slane %v2416_v37, 6 }
  0x94   : > { %2322 = vmatmul.msk.bf16.gmra.mxu0 %vm370_vm4, %v1040_v41  ;;  %v1034_v41 = vunpack.c.l.b16 %v1018_v31  ;;  %v1543_v56 = vrot.slane %v1541_v48, 4  ;;  %v1747_v4 = vrot.slane %v1745_v17, 4  ;;  %v1542_v9 = vsel %vm2679_vm3, %v2439_v54, %v1541_v48  ;;  %v2419_v31 = vld [vmem:[%s2677_s7 + $0x40] sm:$0xf] }
  0x95   : > { %v1595_v18 = vunpack.c.l.b16 %v1542_v9  ;;  %v1752_v50 = vrot.slane %v2419_v31, 6 }
  0x96   : > { %v1042_v51 = vpack.c.b16 %v1034_v41, %v1033_v39  ;;  %v1545_v62 = vsel %vm2679_vm3, %v1543_v56, %v1544_v58  ;;  %v2327_v39 = vld [vmem:[%s2677_s7 + $0x24] sm:$0xc]  ;;  %v2328_v41 = vld [vmem:[%s2677_s7 + $0x2c] sm:$0x3]  ;;  %v2457_v56 = vld [vmem:[%s2677_s7 + $0x3c] sm:$0xc] }
  0x97   : > { %v1596_v57 = vunpack.c.l.b16 %v1545_v62  ;;  %v2342_v27 = vrot.slane %v2327_v39, 10  ;;  %v1179_v48 = vrot.slane %v2328_v41, 6  ;;  %v2458_v58 = vld [vmem:[%s2677_s7 + $0x44] sm:$0x3]  ;;  %v2472_v7 = vrot.slane %v2457_v56, 10  ;;  %v2507_v41 = vld [vmem:[%s2677_s7 + $0x3c] sm:$0xff] }
  0x98   : > { %v1754_v8 = vrot.slane %v1752_v50, 4  ;;  %v1755_v9 = vrot.slane %v2458_v58, 6 }
  0x99   : > { %v1611_v42 = vpack.c.b16 %v1596_v57, %v1595_v18  ;;  %v1177_v63 = vsel %vm2792_vm6, %v2342_v27, %v1176_v30  ;;  %v1180_v0 = vsel %vm2792_vm6, %v1178_v45, %v1179_v48  ;;  %v2329_v48 = vld [vmem:[%s2677_s7 + $0x30] sm:$0xc] }
  0x9a   : > { %v1225_v62 = vunpack.c.l.b16 %v1177_v63  ;;  %v1226_v18 = vunpack.c.l.b16 %v1180_v0  ;;  %v1756_v30 = vsel %vm2792_vm6, %v1754_v8, %v1755_v9 }
  0x9b   : > { %v2948_v35 = vpop.f32.mrf.mxu1  ;;  %v1802_v45 = vunpack.c.l.b16 %v1756_v30 }
  0x9e   : > { %2209 = vmatmul.msk.bf16.gmra.mxu1 %vm370_vm4, %v2496_v59  ;;  %v2455_v59 = vld [vmem:[%s2677_s7 + $0x30] sm:$0xc] }
  0x9f   : > { %2225 = vmatmul.msk.bf16.gmra.mxu2 %vm370_vm4, %v669_v11  ;;  %v2456_v11 = vld [vmem:[%s2677_s7 + $0x38] sm:$0x3]  ;;  %v2471_v3 = vrot.slane %v2455_v59, 10 }
  0xa1   : > { %v2959_v14 = vpop.f32.mrf.mxu0  ;;  %2283 = vmatmul.msk.bf16.gmra.mxu3 %vm370_vm4, %v2504_v2  ;;  %v1746_v22 = vsel %vm2792_vm6, %v2471_v3, %v1745_v17  ;;  %v1551_v17 = vrot.slane %v2420_v25, 5  ;;  %v2330_v25 = vld [vmem:[%s2677_s7 + $0x38] sm:$0x3] }
  0xa2   : > { %v2963_v15 = vpop.f32.mrf.mxu2 }
  0xa3   : > { %v2967_v19 = vpop.f32.mrf.mxu1 }
  0xa4   : > { %2323 = vmatmul.msk.bf16.gmra.mxu0 %vm370_vm4, %v1041_v6  ;;  %v2970_v21 = vpop.f32.mrf.mxu3  ;;  %v1748_v6 = vrot.slane %v2456_v11, 6 }
  0xa6   : > { %v1749_v23 = vsel %vm2792_vm6, %v1747_v4, %v1748_v6 }
  0xa7   : > { %v1800_v37 = vunpack.c.l.b16 %v1749_v23 }
  0xa9   : > { %v2976_v29 = vpop.f32.mrf.mxu0 }
  0xaa   : > { %v2982_v32 = vpop.f32.mrf.mxu2 }
  0xab   : > { %v2986_v34 = vpop.f32.mrf.mxu1 }
  0xac   : > { %v2989_v38 = vpop.f32.mrf.mxu3 }
  0xae   : > { %2210 = vmatmul.msk.bf16.gmra.mxu1 %vm370_vm4, %v2497_v33 }
  0xaf   : > { %2226 = vmatmul.msk.bf16.gmra.mxu2 %vm370_vm4, %v670_v36  ;;  %v1799_v36 = vunpack.c.l.b16 %v1746_v22 }
  0xb1   : > { %v2998_v52 = vpop.f32.mrf.mxu0  ;;  %2284 = vmatmul.msk.bf16.gmra.mxu3 %vm370_vm4, %v2505_v44  ;;  %v1548_v44 = vrot.slane %v2419_v31, 5  ;;  %v1815_v60 = vpack.c.b16 %v1800_v37, %v1799_v36  ;;  %v1183_v36 = vrot.slane %v2839_v53, 6  ;;  %v2343_v53 = vrot.slane %v2329_v48, 10 }
  0xb2   : > { %v3001_v55 = vpop.f32.mrf.mxu2 }
  0xb3   : > { %v3005_v61 = vpop.f32.mrf.mxu1  ;;  %v1550_v54 = vrot.slane %v1548_v44, 4  ;;  %v1184_v9 = vsel %vm2792_vm6, %v2343_v53, %v1183_v36 }
  0xb4   : > { %2324 = vmatmul.msk.bf16.gmra.mxu0 %vm370_vm4, %v1042_v51  ;;  %v3012_v2 = vpop.f32.mrf.mxu3 }
  0xb5   : > { %v1552_v22 = vsel %vm2679_vm3, %v1550_v54, %v1551_v17  ;;  %v1186_v54 = vrot.slane %v2330_v25, 6  ;;  %v2423_v17 = vld [vmem:[%s2677_s7 + $0x50] sm:$0x1]  ;;  %v2508_v25 = vld [vmem:[%s2677_s7 + $0x48] sm:$0xff] }
  0xb9   : > { %v3018_v16 = vpop.f32.mrf.mxu0 }
  0xba   : > { %v3024_v24 = vpop.f32.mrf.mxu2 }
  0xbb   : > { %v516_v28 = vpop.f32.mrf.mxu1 }
  0xbc   : > { %v3029_v33 = vpop.f32.mrf.mxu3  ;;  %v517_v13 = vadd.f32 %v516_v28, %v2959_v14  ;;  %v2440_v14 = vrot.slane %v2418_v43, 9 }
  0xbe   : > { %2349 = vmatmul.msk.bf16.vlgmr.msra.gmra.mxu1 %vm370_vm4, %v1239_v26  ;;  %v1549_v57 = vsel %vm2679_vm3, %v2440_v14, %v1548_v44  ;;  %v2421_v14 = vld [vmem:[%s2677_s7 + $0x48] sm:$0xe] }
  0xbf   : > { %2407 = vmatmul.msk.bf16.vlgmr.msra.gmra.mxu2 %vm370_vm4, %v2506_v46  ;;  %v1597_v28 = vunpack.c.l.b16 %v1549_v57  ;;  %v1753_v46 = vsel %vm2792_vm6, %v2472_v7, %v1752_v50 }
  0xc0   : > { %v1801_v27 = vunpack.c.l.b16 %v1753_v46  ;;  %v1227_v46 = vunpack.c.l.b16 %v1184_v9 }
  0xc1   : > { %v1079_v49 = vpop.f32.mrf.mxu0  ;;  %2447 = vmatmul.msk.bf16.vlgmr.msra.gmra.mxu3 %vm370_vm4, %v1611_v42  ;;  %v2422_v42 = vld [vmem:[%s2677_s7 + $0x4c] sm:$0xf] }
  0xc2   : > { %v707_v51 = vpop.f32.mrf.mxu2  ;;  %v1555_v50 = vrot.slane %v2422_v42, 5  ;;  %v1816_v56 = vpack.c.b16 %v1802_v45, %v1801_v27  ;;  %v1190_v27 = vrot.slane %v2862_v20, 6 }
  0xc3   : > { %v747_v59 = vadd.f32 %v707_v51, %v517_v13  ;;  %v518_v11 = vpop.f32.mrf.mxu1  ;;  %v1240_v13 = vpack.c.b16 %v1226_v18, %v1225_v62  ;;  %v1185_v51 = vrot.slane %v1183_v36, 4 }
  0xc4   : > { %2479 = vmatmul.msk.bf16.vlgmr.msra.gmra.mxu0 %vm370_vm4, %v1815_v60  ;;  %v859_v3 = vpop.f32.mrf.mxu3  ;;  %v519_v4 = vadd.f32 %v518_v11, %v2976_v29  ;;  %v1598_v29 = vunpack.c.l.b16 %v1552_v22  ;;  %v1759_v11 = vrot.slane %v2422_v42, 6  ;;  %v1557_v0 = vrot.slane %v1555_v50, 4 }
  0xc5   : > { %v899_v6 = vadd.f32 %v859_v3, %v747_v59  ;;  %v2441_v59 = vrot.slane %v2421_v14, 9  ;;  %v1558_v3 = vrot.slane %v2423_v17, 5  ;;  %v1187_v62 = vsel %vm2792_vm6, %v1185_v51, %v1186_v54  ;;  %v2331_v51 = vld [vmem:[%s2677_s7 + $0x3c] sm:$0xc]  ;;  %v2332_v54 = vld [vmem:[%s2677_s7 + $0x44] sm:$0x3] }
  0xc6   : > { %v1228_v30 = vunpack.c.l.b16 %v1187_v62  ;;  %v2344_v20 = vrot.slane %v2331_v51, 10  ;;  %v2509_v51 = vld [vmem:[%s2677_s7 + $0x54] sm:$0xff] }
  0xc7   : > { %v3051_v23 = vadd.f32 %v1079_v49, %v899_v6  ;;  %v1612_v49 = vpack.c.b16 %v1598_v29, %v1597_v28  ;;  %v2460_v6 = vld [vmem:[%s2677_s7 + $0x50] sm:$0x3]  ;;  %v1761_v28 = vrot.slane %v1759_v11, 4 }
  0xc8   : > { %v1762_v29 = vrot.slane %v2460_v6, 6 }
  0xc9   : > { %v1081_v26 = vpop.f32.mrf.mxu0 }
  0xca   : > { %v709_v31 = vpop.f32.mrf.mxu2  ;;  %v1763_v42 = vsel %vm2792_vm6, %v1761_v28, %v1762_v29  ;;  %v1191_v28 = vsel %vm2792_vm6, %v2344_v20, %v1190_v27  ;;  %v2333_v20 = vld [vmem:[%s2677_s7 + $0x48] sm:$0xc] }
  0xcb   : > { %v748_v37 = vadd.f32 %v709_v31, %v519_v4  ;;  %v521_v39 = vpop.f32.mrf.mxu1  ;;  %v2459_v4 = vld [vmem:[%s2677_s7 + $0x48] sm:$0xc]  ;;  %v1556_v31 = vsel %vm2679_vm3, %v2441_v59, %v1555_v50  ;;  %v1804_v53 = vunpack.c.l.b16 %v1763_v42 }
  0xcc   : > { %v861_v43 = vpop.f32.mrf.mxu3  ;;  %v522_v44 = vadd.f32 %v521_v39, %v2998_v52  ;;  %v1599_v39 = vunpack.c.l.b16 %v1556_v31 }
  0xcd   : > { %v900_v60 = vadd.f32 %v861_v43, %v748_v37 }
  0xce   : > { %2350 = vmatmul.msk.bf16.gmra.mxu1 %vm370_vm4, %v1240_v13  ;;  %v1559_v13 = vsel %vm2679_vm3, %v1557_v0, %v1558_v3  ;;  %v2426_v0 = vld [vmem:[%s2677_s7 + $0x5c] sm:$0x1] }
  0xcf   : > { %2408 = vmatmul.msk.bf16.gmra.mxu2 %vm370_vm4, %v2507_v41  ;;  %v3067_v52 = vadd.f32 %v1081_v26, %v900_v60  ;;  %v2473_v26 = vrot.slane %v2459_v4, 10  ;;  %v2425_v60 = vld [vmem:[%s2677_s7 + $0x58] sm:$0xf]  ;;  %v1565_v62 = vrot.slane %v2426_v0, 5 }
  0xd0   : > { %v1562_v59 = vrot.slane %v2425_v60, 5 }
  0xd1   : > { %v1084_v58 = vpop.f32.mrf.mxu0  ;;  %2448 = vmatmul.msk.bf16.gmra.mxu3 %vm370_vm4, %v1612_v49  ;;  %v1760_v41 = vsel %vm2792_vm6, %v2473_v26, %v1759_v11  ;;  %v1192_v11 = vrot.slane %v1190_v27, 4 }
  0xd2   : > { %v712_v63 = vpop.f32.mrf.mxu2  ;;  %v1803_v50 = vunpack.c.l.b16 %v1760_v41  ;;  %v1564_v9 = vrot.slane %v1562_v59, 4 }
  0xd3   : > { %v749_v7 = vadd.f32 %v712_v63, %v522_v44  ;;  %v523_v8 = vpop.f32.mrf.mxu1  ;;  %v1241_v44 = vpack.c.b16 %v1228_v30, %v1227_v46  ;;  %v1193_v63 = vrot.slane %v2332_v54, 6  ;;  %v2428_v54 = vld [vmem:[%s2677_s7 + $0x64] sm:$0xf] }
  0xd4   : > { %2480 = vmatmul.msk.bf16.gmra.mxu0 %vm370_vm4, %v1816_v56  ;;  %v864_v18 = vpop.f32.mrf.mxu3  ;;  %v524_v57 = vadd.f32 %v523_v8, %v3018_v16  ;;  %v1600_v16 = vunpack.c.l.b16 %v1559_v13  ;;  %v1817_v3 = vpack.c.b16 %v1804_v53, %v1803_v50 }
  0xd5   : > { %v901_v22 = vadd.f32 %v864_v18, %v749_v7  ;;  %v1766_v7 = vrot.slane %v2425_v60, 6  ;;  %v2461_v18 = vld [vmem:[%s2677_s7 + $0x54] sm:$0xc]  ;;  %v1194_v29 = vsel %vm2792_vm6, %v1192_v11, %v1193_v63  ;;  %v2334_v11 = vld [vmem:[%s2677_s7 + $0x50] sm:$0x3] }
  0xd6   : > { %v1613_v56 = vpack.c.b16 %v1600_v16, %v1599_v39  ;;  %v2474_v13 = vrot.slane %v2461_v18, 10  ;;  %v1229_v16 = vunpack.c.l.b16 %v1191_v28  ;;  %v1230_v41 = vunpack.c.l.b16 %v1194_v29  ;;  %v2463_v29 = vld [vmem:[%s2677_s7 + $0x60] sm:$0xc] }
  0xd7   : > { %v3082_v36 = vadd.f32 %v1084_v58, %v901_v22  ;;  %v2424_v58 = vld [vmem:[%s2677_s7 + $0x54] sm:$0xe] }
  0xd8   : > { %v2442_v6 = vrot.slane %v2424_v58, 9 }
  0xd9   : > { %v1086_v37 = vpop.f32.mrf.mxu0 }
  0xda   : > { %v714_v43 = vpop.f32.mrf.mxu2  ;;  %v1563_v42 = vsel %vm2679_vm3, %v2442_v6, %v1562_v59 }
  0xdb   : > { %v750_v45 = vadd.f32 %v714_v43, %v524_v57  ;;  %v526_v48 = vpop.f32.mrf.mxu1  ;;  %v2462_v57 = vld [vmem:[%s2677_s7 + $0x5c] sm:$0x3]  ;;  %v1566_v43 = vsel %vm2679_vm3, %v1564_v9, %v1565_v62 }
  0xdc   : > { %v866_v49 = vpop.f32.mrf.mxu3  ;;  %v527_v14 = vadd.f32 %v526_v48, %v2948_v35  ;;  %v1769_v39 = vrot.slane %v2462_v57, 6  ;;  %v1767_v48 = vsel %vm2792_vm6, %v2474_v13, %v1766_v7  ;;  %v1773_v57 = vrot.slane %v2428_v54, 6 }
  0xdd   : > { %v902_v17 = vadd.f32 %v866_v49, %v750_v45  ;;  %v1601_v45 = vunpack.c.l.b16 %v1563_v42  ;;  %v1242_v49 = vpack.c.b16 %v1230_v41, %v1229_v16  ;;  %v1805_v58 = vunpack.c.l.b16 %v1767_v48 }
  0xde   : > { %2351 = vmatmul.msk.bf16.gmra.mxu1 %vm370_vm4, %v1241_v44  ;;  %v2475_v42 = vrot.slane %v2463_v29, 10 }
  0xdf   : > { %2409 = vmatmul.msk.bf16.gmra.mxu2 %vm370_vm4, %v2508_v25  ;;  %v3098_v35 = vadd.f32 %v1086_v37, %v902_v17  ;;  %v1768_v37 = vrot.slane %v1766_v7, 4  ;;  %v1200_v7 = vrot.slane %v2334_v11, 6 }
  0xe1   : > { %v1089_v4 = vpop.f32.mrf.mxu0  ;;  %2449 = vmatmul.msk.bf16.gmra.mxu3 %vm370_vm4, %v1613_v56  ;;  %v1770_v25 = vsel %vm2792_vm6, %v1768_v37, %v1769_v39 }
  0xe2   : > { %v717_v8 = vpop.f32.mrf.mxu2  ;;  %v1806_v59 = vunpack.c.l.b16 %v1770_v25 }
  0xe3   : > { %v751_v22 = vadd.f32 %v717_v8, %v527_v14  ;;  %v528_v26 = vpop.f32.mrf.mxu1  ;;  %v1197_v14 = vrot.slane %v2885_v47, 6  ;;  %v2345_v47 = vrot.slane %v2333_v20, 10  ;;  %v2429_v8 = vld [vmem:[%s2677_s7 + $0x68] sm:$0x1]  ;;  %v2431_v20 = vld [vmem:[%s2677_s7 + $0x70] sm:$0xf] }
  0xe4   : > { %2481 = vmatmul.msk.bf16.gmra.mxu0 %vm370_vm4, %v1817_v3  ;;  %v869_v46 = vpop.f32.mrf.mxu3  ;;  %v529_v30 = vadd.f32 %v528_v26, %v2967_v19  ;;  %v1602_v19 = vunpack.c.l.b16 %v1566_v43  ;;  %v2427_v3 = vld [vmem:[%s2677_s7 + $0x60] sm:$0xe]  ;;  %v1818_v9 = vpack.c.b16 %v1806_v59, %v1805_v58  ;;  %v1572_v28 = vrot.slane %v2429_v8, 5 }
  0xe5   : > { %v903_v31 = vadd.f32 %v869_v46, %v751_v22  ;;  %v1199_v6 = vrot.slane %v1197_v14, 4  ;;  %v2443_v18 = vrot.slane %v2427_v3, 9  ;;  %v2464_v46 = vld [vmem:[%s2677_s7 + $0x68] sm:$0x3]  ;;  %v1198_v13 = vsel %vm2792_vm6, %v2345_v47, %v1197_v14  ;;  %v2510_v59 = vld [vmem:[%s2677_s7 + $0x60] sm:$0xff] }
  0xe6   : > { %v1614_v0 = vpack.c.b16 %v1602_v19, %v1601_v45  ;;  %v1775_v43 = vrot.slane %v1773_v57, 4  ;;  %v1231_v45 = vunpack.c.l.b16 %v1198_v13  ;;  %v2335_v3 = vld [vmem:[%s2677_s7 + $0x54] sm:$0xc]  ;;  %v1576_v8 = vrot.slane %v2431_v20, 5 }
  0xe7   : > { %v3113_v44 = vadd.f32 %v1089_v4, %v903_v31  ;;  %v1569_v4 = vrot.slane %v2428_v54, 5  ;;  %v1201_v37 = vsel %vm2792_vm6, %v1199_v6, %v1200_v7  ;;  %v2430_v7 = vld [vmem:[%s2677_s7 + $0x6c] sm:$0xe] }
  0xe8   : > { %v1232_v19 = vunpack.c.l.b16 %v1201_v37  ;;  %v2444_v29 = vrot.slane %v2430_v7, 9  ;;  %v1578_v13 = vrot.slane %v1576_v8, 4  ;;  %v2337_v7 = vld [vmem:[%s2677_s7 + $0x60] sm:$0xc] }
  0xe9   : > { %v1091_v27 = vpop.f32.mrf.mxu0  ;;  %v1571_v26 = vrot.slane %v1569_v4, 4  ;;  %v1570_v48 = vsel %vm2679_vm3, %v2443_v18, %v1569_v4  ;;  %v2336_v4 = vld [vmem:[%s2677_s7 + $0x5c] sm:$0x3]  ;;  %v2432_v18 = vld [vmem:[%s2677_s7 + $0x74] sm:$0x1] }
  0xea   : > { %v719_v60 = vpop.f32.mrf.mxu2  ;;  %v1243_v54 = vpack.c.b16 %v1232_v19, %v1231_v45  ;;  %v1579_v37 = vrot.slane %v2432_v18, 5  ;;  %v1577_v19 = vsel %vm2679_vm3, %v2444_v29, %v1576_v8  ;;  %v2338_v8 = vld [vmem:[%s2677_s7 + $0x68] sm:$0x3] }
  0xeb   : > { %v752_v50 = vadd.f32 %v719_v60, %v529_v30  ;;  %v531_v53 = vpop.f32.mrf.mxu1  ;;  %v1573_v25 = vsel %vm2679_vm3, %v1571_v26, %v1572_v28 }
  0xec   : > { %v871_v17 = vpop.f32.mrf.mxu3  ;;  %v532_v56 = vadd.f32 %v531_v53, %v2986_v34  ;;  %v1604_v14 = vunpack.c.l.b16 %v1573_v25 }
  0xed   : > { %v904_v63 = vadd.f32 %v871_v17, %v752_v50  ;;  %v1774_v50 = vsel %vm2792_vm6, %v2475_v42, %v1773_v57  ;;  %v1204_v17 = vrot.slane %v2908_v12, 6  ;;  %v2346_v12 = vrot.slane %v2335_v3, 10  ;;  %v2511_v3 = vld [vmem:[%s2677_s7 + $0x6c] sm:$0xff] }
  0xee   : > { %2352 = vmatmul.msk.bf16.gmra.mxu1 %vm370_vm4, %v1242_v49 }
  0xef   : > { %2410 = vmatmul.msk.bf16.gmra.mxu2 %vm370_vm4, %v2509_v51  ;;  %v3129_v34 = vadd.f32 %v1091_v27, %v904_v63  ;;  %v1776_v27 = vrot.slane %v2464_v46, 6  ;;  %v1807_v63 = vunpack.c.l.b16 %v1774_v50  ;;  %v2465_v46 = vld [vmem:[%s2677_s7 + $0x6c] sm:$0xc]  ;;  %v1205_v42 = vsel %vm2792_vm6, %v2346_v12, %v1204_v17 }
  0xf1   : > { %v1094_v62 = vpop.f32.mrf.mxu0  ;;  %2450 = vmatmul.msk.bf16.gmra.mxu3 %vm370_vm4, %v1614_v0  ;;  %v1777_v53 = vsel %vm2792_vm6, %v1775_v43, %v1776_v27  ;;  %v2476_v27 = vrot.slane %v2465_v46, 10 }
  0xf2   : > { %v722_v22 = vpop.f32.mrf.mxu2  ;;  %v1808_v0 = vunpack.c.l.b16 %v1777_v53  ;;  %v1605_v53 = vunpack.c.l.b16 %v1577_v19 }
  0xf3   : > { %v753_v30 = vadd.f32 %v722_v22, %v532_v56  ;;  %v533_v31 = vpop.f32.mrf.mxu1 }
  0xf4   : > { %2482 = vmatmul.msk.bf16.gmra.mxu0 %vm370_vm4, %v1818_v9  ;;  %v874_v39 = vpop.f32.mrf.mxu3  ;;  %v534_v16 = vadd.f32 %v533_v31, %v3005_v61  ;;  %v1603_v61 = vunpack.c.l.b16 %v1570_v48  ;;  %v1206_v9 = vrot.slane %v1204_v17, 4  ;;  %v1819_v57 = vpack.c.b16 %v1808_v0, %v1807_v63 }
  0xf5   : > { %v905_v41 = vadd.f32 %v874_v39, %v753_v30  ;;  %v1780_v30 = vrot.slane %v2431_v20, 6  ;;  %v2466_v39 = vld [vmem:[%s2677_s7 + $0x74] sm:$0x3] }
  0xf6   : > { %v1615_v6 = vpack.c.b16 %v1604_v14, %v1603_v61  ;;  %v1783_v25 = vrot.slane %v2466_v39, 6  ;;  %v1580_v14 = vsel %vm2679_vm3, %v1578_v13, %v1579_v37  ;;  %v2467_v37 = vld [vmem:[%s2677_s7 + $0x78] sm:$0xc] }
  0xf7   : > { %v3144_v60 = vadd.f32 %v1094_v62, %v905_v41  ;;  %v1207_v62 = vrot.slane %v2336_v4, 6  ;;  %v1782_v48 = vrot.slane %v1780_v30, 4  ;;  %v1606_v17 = vunpack.c.l.b16 %v1580_v14  ;;  %v2434_v4 = vld [vmem:[%s2677_s7 + $0x7c] sm:$0xf] }
  0xf8   : > { %v1583_v18 = vrot.slane %v2434_v4, 5  ;;  %v1787_v39 = vrot.slane %v2434_v4, 6  ;;  %v1218_v4 = vrot.slane %v2956_v5, 6 }
  0xf9   : > { %v1096_v49 = vpop.f32.mrf.mxu0  ;;  %v1208_v43 = vsel %vm2792_vm6, %v1206_v9, %v1207_v62  ;;  %v1616_v9 = vpack.c.b16 %v1606_v17, %v1605_v53  ;;  %v2433_v62 = vld [vmem:[%s2677_s7 + $0x78] sm:$0xe] }
  0xfa   : > { %v724_v51 = vpop.f32.mrf.mxu2  ;;  %v1234_v61 = vunpack.c.l.b16 %v1208_v43  ;;  %v2445_v13 = vrot.slane %v2433_v62, 9  ;;  %v2468_v43 = vld [vmem:[%s2677_s7 + $0x80] sm:$0x3]  ;;  %v2340_v62 = vld [vmem:[%s2677_s7 + $0x74] sm:$0x3] }
  0xfb   : > { %v754_v56 = vadd.f32 %v724_v51, %v534_v16  ;;  %v536_v58 = vpop.f32.mrf.mxu1  ;;  %v1790_v14 = vrot.slane %v2468_v43, 6 }
  0xfc   : > { %v876_v11 = vpop.f32.mrf.mxu3  ;;  %v537_v26 = vadd.f32 %v536_v58, %v2963_v15  ;;  %v1784_v58 = vsel %vm2792_vm6, %v1782_v48, %v1783_v25  ;;  %v2477_v48 = vrot.slane %v2467_v37, 10 }
  0xfd   : > { %v906_v47 = vadd.f32 %v876_v11, %v754_v56  ;;  %v1781_v56 = vsel %vm2792_vm6, %v2476_v27, %v1780_v30  ;;  %v1211_v11 = vrot.slane %v2931_v40, 6  ;;  %v2347_v40 = vrot.slane %v2337_v7, 10  ;;  %v2437_v7 = vld [vmem:[%s2677_s7 + $0x88] sm:$0xf] }
  0xfe   : > { %2353 = vmatmul.msk.bf16.gmra.mxu1 %vm370_vm4, %v1243_v54 }
  0xff   : > { %2411 = vmatmul.msk.bf16.gmra.mxu2 %vm370_vm4, %v2510_v59  ;;  %v3159_v22 = vadd.f32 %v1096_v49, %v906_v47  ;;  %v1233_v49 = vunpack.c.l.b16 %v1205_v42  ;;  %v1809_v47 = vunpack.c.l.b16 %v1781_v56 }
 0x101   : > { %v1099_v28 = vpop.f32.mrf.mxu0  ;;  %2451 = vmatmul.msk.bf16.gmra.mxu3 %vm370_vm4, %v1615_v6  ;;  %v1244_v20 = vpack.c.b16 %v1234_v61, %v1233_v49  ;;  %v1810_v6 = vunpack.c.l.b16 %v1784_v58  ;;  %v1584_v49 = vsel %vm2679_vm3, %v2445_v13, %v1583_v18  ;;  %v1789_v61 = vrot.slane %v1787_v39, 4 }
 0x102   : > { %v727_v31 = vpop.f32.mrf.mxu2  ;;  %v1607_v56 = vunpack.c.l.b16 %v1584_v49 }
 0x103   : > { %v755_v16 = vadd.f32 %v727_v31, %v537_v26  ;;  %v538_v41 = vpop.f32.mrf.mxu1  ;;  %v1214_v26 = vrot.slane %v2338_v8, 6  ;;  %v1820_v29 = vpack.c.b16 %v1810_v6, %v1809_v47  ;;  %v2512_v6 = vld [vmem:[%s2677_s7 + $0x78] sm:$0xff] }
 0x104   : > { %2483 = vmatmul.msk.bf16.gmra.mxu0 %vm370_vm4, %v1819_v57  ;;  %v879_v15 = vpop.f32.mrf.mxu3  ;;  %v539_v51 = vadd.f32 %v538_v41, %v2982_v32  ;;  %v1213_v57 = vrot.slane %v1211_v11, 4  ;;  %v1585_v41 = vrot.slane %v1583_v18, 4 }
 0x105   : > { %v907_v45 = vadd.f32 %v879_v15, %v755_v16 }
 0x106   : > { %v1215_v19 = vsel %vm2792_vm6, %v1213_v57, %v1214_v26  ;;  %v2436_v57 = vld [vmem:[%s2677_s7 + $0x84] sm:$0xe]  ;;  %v1590_v26 = vrot.slane %v2437_v7, 5 }
 0x107   : > { %v3174_v50 = vadd.f32 %v1099_v28, %v907_v45  ;;  %v2435_v28 = vld [vmem:[%s2677_s7 + $0x80] sm:$0x1]  ;;  %v1212_v45 = vsel %vm2792_vm6, %v2347_v40, %v1211_v11  ;;  %v1788_v11 = vsel %vm2792_vm6, %v2477_v48, %v1787_v39 }
 0x108   : > { %v1586_v42 = vrot.slane %v2435_v28, 5  ;;  %v1235_v53 = vunpack.c.l.b16 %v1212_v45  ;;  %v1811_v8 = vunpack.c.l.b16 %v1788_v11  ;;  %v1220_v28 = vrot.slane %v1218_v4, 4  ;;  %v2470_v45 = vld [vmem:[%s2677_s7 + $0x8c] sm:$0x3] }
 0x109   : > { %v1101_v54 = vpop.f32.mrf.mxu0 }
 0x10a   : > { %v729_v59 = vpop.f32.mrf.mxu2 }
 0x10b   : > { %v756_v63 = vadd.f32 %v729_v59, %v539_v51  ;;  %v541_v0 = vpop.f32.mrf.mxu1  ;;  %v1236_v51 = vunpack.c.l.b16 %v1215_v19 }
 0x10c   : > { %v881_v32 = vpop.f32.mrf.mxu3  ;;  %v542_v30 = vadd.f32 %v541_v0, %v3001_v55 }
 0x10d   : > { %v908_v12 = vadd.f32 %v881_v32, %v756_v63  ;;  %v1791_v63 = vsel %vm2792_vm6, %v1789_v61, %v1790_v14 }
 0x10e   : > { %2354 = vmatmul.msk.bf16.gmra.mxu1 %vm370_vm4, %v1244_v20 }
 0x10f   : > { %2412 = vmatmul.msk.bf16.gmra.mxu2 %vm370_vm4, %v2511_v3  ;;  %v3190_v46 = vadd.f32 %v1101_v54, %v908_v12  ;;  %v1587_v54 = vsel %vm2679_vm3, %v1585_v41, %v1586_v42  ;;  %v1245_v3 = vpack.c.b16 %v1236_v51, %v1235_v53  ;;  %v1812_v12 = vunpack.c.l.b16 %v1791_v63  ;;  %v2469_v41 = vld [vmem:[%s2677_s7 + $0x84] sm:$0xc] }
 0x110   : > { %v1608_v20 = vunpack.c.l.b16 %v1587_v54  ;;  %v1794_v42 = vrot.slane %v2437_v7, 6  ;;  %v2478_v49 = vrot.slane %v2469_v41, 10  ;;  %v1797_v51 = vrot.slane %v2470_v45, 6 }
 0x111   : > { %v1104_v31 = vpop.f32.mrf.mxu0  ;;  %2452 = vmatmul.msk.bf16.gmra.mxu3 %vm370_vm4, %v1616_v9  ;;  %v2339_v9 = vld [vmem:[%s2677_s7 + $0x6c] sm:$0xc]  ;;  %v1821_v13 = vpack.c.b16 %v1812_v12, %v1811_v8 }
 0x112   : > { %v732_v16 = vpop.f32.mrf.mxu2  ;;  %v1617_v40 = vpack.c.b16 %v1608_v20, %v1607_v56  ;;  %v2348_v5 = vrot.slane %v2339_v9, 10  ;;  %v1796_v53 = vrot.slane %v1794_v42, 4 }
 0x113   : > { %v757_v15 = vadd.f32 %v732_v16, %v542_v30  ;;  %v543_v27 = vpop.f32.mrf.mxu1  ;;  %v2438_v30 = vld [vmem:[%s2677_s7 + $0x8c] sm:$0x1]  ;;  %v2446_v16 = vrot.slane %v2436_v57, 9 }
 0x114   : > { %2484 = vmatmul.msk.bf16.gmra.mxu0 %vm370_vm4, %v1820_v29  ;;  %v884_v55 = vpop.f32.mrf.mxu3  ;;  %v544_v58 = vadd.f32 %v543_v27, %v3024_v24  ;;  %v1221_v29 = vrot.slane %v2340_v62, 6  ;;  %v1593_v27 = vrot.slane %v2438_v30, 5  ;;  %v1219_v48 = vsel %vm2792_vm6, %v2348_v5, %v1218_v4 }
 0x115   : > { %v909_v25 = vadd.f32 %v884_v55, %v757_v15  ;;  %v1592_v15 = vrot.slane %v1590_v26, 4  ;;  %v1591_v14 = vsel %vm2679_vm3, %v2446_v16, %v1590_v26  ;;  %v1237_v54 = vunpack.c.l.b16 %v1219_v48 }
 0x116   : > { %v1609_v20 = vunpack.c.l.b16 %v1591_v14  ;;  %v1798_v4 = vsel %vm2792_vm6, %v1796_v53, %v1797_v51 }
 0x117   : > { %v3205_v17 = vadd.f32 %v1104_v31, %v909_v25  ;;  %v1222_v25 = vsel %vm2792_vm6, %v1220_v28, %v1221_v29  ;;  %v1814_v12 = vunpack.c.l.b16 %v1798_v4 }
 0x118   : > { %v1238_v56 = vunpack.c.l.b16 %v1222_v25 }
 0x119   : > { %v1106_v59 = vpop.f32.mrf.mxu0 }
 0x11a   : > { %v734_v0 = vpop.f32.mrf.mxu2 }
 0x11b   : > { %v758_v32 = vadd.f32 %v734_v0, %v544_v58  ;;  %v546_v47 = vpop.f32.mrf.mxu1  ;;  %v1594_v58 = vsel %vm2679_vm3, %v1592_v15, %v1593_v27 }
 0x11c   : > { %v886_v24 = vpop.f32.mrf.mxu3  ;;  %v547_v37 = vadd.f32 %v546_v47, %v2970_v21  ;;  %v1610_v0 = vunpack.c.l.b16 %v1594_v58  ;;  %v1246_v47 = vpack.c.b16 %v1238_v56, %v1237_v54 }
 0x11d   : > { %v910_v18 = vadd.f32 %v886_v24, %v758_v32 }
 0x11e   : > { %2355 = vmatmul.msk.bf16.gmra.mxu1 %vm370_vm4, %v1245_v3  ;;  %v1795_v3 = vsel %vm2792_vm6, %v2478_v49, %v1794_v42  ;;  %v1618_v62 = vpack.c.b16 %v1610_v0, %v1609_v20 }
 0x11f   : > { %2413 = vmatmul.msk.bf16.gmra.mxu2 %vm370_vm4, %v2512_v6  ;;  %v3221_v31 = vadd.f32 %v1106_v59, %v910_v18  ;;  %v1813_v8 = vunpack.c.l.b16 %v1795_v3 }
 0x121   : > { %v1109_v39 = vpop.f32.mrf.mxu0  ;;  %2453 = vmatmul.msk.bf16.gmra.mxu3 %vm370_vm4, %v1617_v40  ;;  %v1822_v18 = vpack.c.b16 %v1814_v12, %v1813_v8 }
 0x122   : > { %v737_v43 = vpop.f32.mrf.mxu2 }
 0x123   : > { %v759_v19 = vadd.f32 %v737_v43, %v547_v37  ;;  %v548_v55 = vpop.f32.mrf.mxu1 }
 0x124   : > { %2485 = vmatmul.msk.bf16.gmra.mxu0 %vm370_vm4, %v1821_v13  ;;  %v889_v21 = vpop.f32.mrf.mxu3  ;;  %v549_v11 = vadd.f32 %v548_v55, %v2989_v38 }
 0x125   : > { %v911_v61 = vadd.f32 %v889_v21, %v759_v19 }
 0x127   : > { %v3236_v59 = vadd.f32 %v1109_v39, %v911_v61 }
 0x129   : > { %v1111_v63 = vpop.f32.mrf.mxu0 }
 0x12a   : > { %v739_v32 = vpop.f32.mrf.mxu2 }
 0x12b   : > { %v760_v6 = vadd.f32 %v739_v32, %v549_v11  ;;  %v551_v7 = vpop.f32.mrf.mxu1 }
 0x12c   : > { %v891_v24 = vpop.f32.mrf.mxu3  ;;  %v552_v1 = vadd.f32 %v551_v7, %v3012_v2 }
 0x12d   : > { %v912_v9 = vadd.f32 %v891_v24, %v760_v6 }
 0x12e   : > { %2356 = vmatmul.msk.bf16.gmra.mxu1 %vm370_vm4, %v1246_v47 }
 0x12f   : > { %2414 = vmatmul.msk.bf16.gmra.mxu2 %vm370_vm4, %v2513_v10  ;;  %v3246_v38 = vadd.f32 %v1111_v63, %v912_v9 }
 0x131   : > { %v1114_v40 = vpop.f32.mrf.mxu0  ;;  %2454 = vmatmul.msk.bf16.gmra.mxu3 %vm370_vm4, %v1618_v62 }
 0x132   : > { %v742_v57 = vpop.f32.mrf.mxu2 }
 0x133   : > { %v761_v26 = vadd.f32 %v742_v57, %v552_v1  ;;  %v553_v5 = vpop.f32.mrf.mxu1 }
 0x134   : > { %2486 = vmatmul.msk.bf16.gmra.mxu0 %vm370_vm4, %v1822_v18  ;;  %v894_v28 = vpop.f32.mrf.mxu3  ;;  %v554_v13 = vadd.f32 %v553_v5, %v3029_v33 }
 0x135   : > { %v913_v29 = vadd.f32 %v894_v28, %v761_v26 }
 0x137   : > { %v3252_v30 = vadd.f32 %v1114_v40, %v913_v29 }
 0x139   : > { %v1116_v37 = vpop.f32.mrf.mxu0 }
 0x13a   : > { %v744_v2 = vpop.f32.mrf.mxu2 }
 0x13b   : > { %v762_v39 = vadd.f32 %v744_v2, %v554_v13  ;;  %v1283_v16 = vpop.f32.mrf.mxu1 }
 0x13c   : > { %v896_v41 = vpop.f32.mrf.mxu3  ;;  %v1323_v15 = vadd.f32 %v1283_v16, %v3051_v23 }
 0x13d   : > { %v914_v42 = vadd.f32 %v896_v41, %v762_v39 }
 0x13f   : > { %v3256_v43 = vadd.f32 %v1116_v37, %v914_v42 }
 0x141   : > { %v1859_v27 = vpop.f32.mrf.mxu0 }
 0x142   : > { %v1435_v45 = vpop.f32.mrf.mxu2 }
 0x143   : > { %v1475_v19 = vadd.f32 %v1435_v45, %v1323_v15  ;;  %v1285_v55 = vpop.f32.mrf.mxu1 }
 0x144   : > { %v1655_v33 = vpop.f32.mrf.mxu3  ;;  %v1324_v21 = vadd.f32 %v1285_v55, %v3067_v52 }
 0x145   : > { %v1695_v48 = vadd.f32 %v1655_v33, %v1475_v19 }
 0x147   : > { %v1899_v25 = vadd.f32 %v1859_v27, %v1695_v48 }
 0x149   : > { %1915 = vst [vmem:[%s3262_s30] sm:$0xff] %v1899_v25  ;;  %v1861_v49 = vpop.f32.mrf.mxu0  ;;  %v1952_v56 = vmul.f32 %v1899_v25, %v1899_v25 }
 0x14a   : > { %v1437_v23 = vpop.f32.mrf.mxu2 }
 0x14b   : > { %v1476_v61 = vadd.f32 %v1437_v23, %v1324_v21  ;;  %v1288_v14 = vpop.f32.mrf.mxu1 }
 0x14c   : > { %v1657_v53 = vpop.f32.mrf.mxu3  ;;  %v1325_v11 = vadd.f32 %v1288_v14, %v3082_v36 }
 0x14d   : > { %v1696_v51 = vadd.f32 %v1657_v53, %v1476_v61 }
 0x14f   : > { %v1900_v54 = vadd.f32 %v1861_v49, %v1696_v51 }
 0x151   : > { %1916 = vst [vmem:[%s3262_s30 + $0x8] sm:$0xff] %v1900_v54  ;;  %v1931_v58 = vadd.f32 %v1900_v54, %v1899_v25  ;;  %v1953_v20 = vmul.f32 %v1900_v54, %v1900_v54  ;;  %v1864_v63 = vpop.f32.mrf.mxu0 }
 0x152   : > { %v1440_v0 = vpop.f32.mrf.mxu2 }
 0x153   : > { %v1968_v3 = vadd.f32 %v1953_v20, %v1952_v56  ;;  %v1477_v4 = vadd.f32 %v1440_v0, %v1325_v11  ;;  %v1290_v32 = vpop.f32.mrf.mxu1 }
 0x154   : > { %v1660_v52 = vpop.f32.mrf.mxu3  ;;  %v1326_v24 = vadd.f32 %v1290_v32, %v3098_v35 }
 0x155   : > { %v1697_v47 = vadd.f32 %v1660_v52, %v1477_v4 }
 0x157   : > { %v1901_v6 = vadd.f32 %v1864_v63, %v1697_v47 }
 0x159   : > { %1917 = vst [vmem:[%s3262_s30 + $0x10] sm:$0xff] %v1901_v6  ;;  %v1932_v7 = vadd.f32 %v1931_v58, %v1901_v6  ;;  %v1954_v10 = vmul.f32 %v1901_v6, %v1901_v6  ;;  %v1866_v8 = vpop.f32.mrf.mxu0 }
 0x15a   : > { %v1442_v12 = vpop.f32.mrf.mxu2 }
 0x15b   : > { %v1969_v9 = vadd.f32 %v1968_v3, %v1954_v10  ;;  %v1478_v62 = vadd.f32 %v1442_v12, %v1326_v24  ;;  %v1293_v18 = vpop.f32.mrf.mxu1 }
 0x15c   : > { %v1662_v36 = vpop.f32.mrf.mxu3  ;;  %v1327_v5 = vadd.f32 %v1293_v18, %v3113_v44 }
 0x15d   : > { %v1698_v1 = vadd.f32 %v1662_v36, %v1478_v62 }
 0x15f   : > { %v1902_v40 = vadd.f32 %v1866_v8, %v1698_v1 }
 0x161   : > { %1918 = vst [vmem:[%s3262_s30 + $0x18] sm:$0xff] %v1902_v40  ;;  %v1933_v57 = vadd.f32 %v1932_v7, %v1902_v40  ;;  %v1955_v26 = vmul.f32 %v1902_v40, %v1902_v40  ;;  %v1869_v28 = vpop.f32.mrf.mxu0 }
 0x162   : > { %v1445_v29 = vpop.f32.mrf.mxu2 }
 0x163   : > { %v1970_v13 = vadd.f32 %v1969_v9, %v1955_v26  ;;  %v1479_v37 = vadd.f32 %v1445_v29, %v1327_v5  ;;  %v1295_v2 = vpop.f32.mrf.mxu1 }
 0x164   : > { %v1665_v35 = vpop.f32.mrf.mxu3  ;;  %v1328_v15 = vadd.f32 %v1295_v2, %v3129_v34 }
 0x165   : > { %v1699_v39 = vadd.f32 %v1665_v35, %v1479_v37 }
 0x167   : > { %v1903_v16 = vadd.f32 %v1869_v28, %v1699_v39 }
 0x169   : > { %1919 = vst [vmem:[%s3262_s30 + $0x20] sm:$0xff] %v1903_v16  ;;  %v1934_v41 = vadd.f32 %v1933_v57, %v1903_v16  ;;  %v1956_v42 = vmul.f32 %v1903_v16, %v1903_v16  ;;  %v1871_v27 = vpop.f32.mrf.mxu0 }
 0x16a   : > { %v1447_v45 = vpop.f32.mrf.mxu2 }
 0x16b   : > { %v1971_v19 = vadd.f32 %v1970_v13, %v1956_v42  ;;  %v1480_v55 = vadd.f32 %v1447_v45, %v1328_v15  ;;  %v1298_v33 = vpop.f32.mrf.mxu1 }
 0x16c   : > { %v1667_v44 = vpop.f32.mrf.mxu3  ;;  %v1329_v23 = vadd.f32 %v1298_v33, %v3144_v60 }
 0x16d   : > { %v1700_v48 = vadd.f32 %v1667_v44, %v1480_v55 }
 0x16f   : > { %v1904_v25 = vadd.f32 %v1871_v27, %v1700_v48 }
 0x171   : > { %1920 = vst [vmem:[%s3262_s30 + $0x28] sm:$0xff] %v1904_v25  ;;  %v1935_v21 = vadd.f32 %v1934_v41, %v1904_v25  ;;  %v1957_v49 = vmul.f32 %v1904_v25, %v1904_v25  ;;  %v1874_v61 = vpop.f32.mrf.mxu0 }
 0x172   : > { %v1450_v14 = vpop.f32.mrf.mxu2 }
 0x173   : > { %v1972_v53 = vadd.f32 %v1971_v19, %v1957_v49  ;;  %v1481_v51 = vadd.f32 %v1450_v14, %v1329_v23  ;;  %v1300_v54 = vpop.f32.mrf.mxu1 }
 0x174   : > { %v1670_v34 = vpop.f32.mrf.mxu3  ;;  %v1330_v63 = vadd.f32 %v1300_v54, %v3159_v22 }
 0x175   : > { %v1701_v56 = vadd.f32 %v1670_v34, %v1481_v51 }
 0x177   : > { %v1905_v58 = vadd.f32 %v1874_v61, %v1701_v56 }
 0x179   : > { %1921 = vst [vmem:[%s3262_s30 + $0x30] sm:$0xff] %v1905_v58  ;;  %v1936_v20 = vadd.f32 %v1935_v21, %v1905_v58  ;;  %v1958_v11 = vmul.f32 %v1905_v58, %v1905_v58  ;;  %v1876_v0 = vpop.f32.mrf.mxu0 }
 0x17a   : > { %v1452_v3 = vpop.f32.mrf.mxu2 }
 0x17b   : > { %v1973_v4 = vadd.f32 %v1972_v53, %v1958_v11  ;;  %v1482_v32 = vadd.f32 %v1452_v3, %v1330_v63  ;;  %v1303_v52 = vpop.f32.mrf.mxu1 }
 0x17c   : > { %v1672_v60 = vpop.f32.mrf.mxu3  ;;  %v1331_v24 = vadd.f32 %v1303_v52, %v3174_v50 }
 0x17d   : > { %v1702_v47 = vadd.f32 %v1672_v60, %v1482_v32 }
 0x17f   : > { %v1906_v6 = vadd.f32 %v1876_v0, %v1702_v47 }
 0x181   : > { %1922 = vst [vmem:[%s3262_s30 + $0x38] sm:$0xff] %v1906_v6  ;;  %v1937_v7 = vadd.f32 %v1936_v20, %v1906_v6  ;;  %v1959_v10 = vmul.f32 %v1906_v6, %v1906_v6  ;;  %v1879_v8 = vpop.f32.mrf.mxu0 }
 0x182   : > { %v1455_v12 = vpop.f32.mrf.mxu2 }
 0x183   : > { %v1974_v9 = vadd.f32 %v1973_v4, %v1959_v10  ;;  %v1483_v62 = vadd.f32 %v1455_v12, %v1331_v24  ;;  %v1305_v18 = vpop.f32.mrf.mxu1 }
 0x184   : > { %v1675_v22 = vpop.f32.mrf.mxu3  ;;  %v1332_v26 = vadd.f32 %v1305_v18, %v3190_v46 }
 0x185   : > { %v1703_v36 = vadd.f32 %v1675_v22, %v1483_v62 }
 0x187   : > { %v1907_v1 = vadd.f32 %v1879_v8, %v1703_v36 }
 0x189   : > { %1923 = vst [vmem:[%s3262_s30 + $0x40] sm:$0xff] %v1907_v1  ;;  %v1938_v40 = vadd.f32 %v1937_v7, %v1907_v1  ;;  %v1960_v57 = vmul.f32 %v1907_v1, %v1907_v1  ;;  %v1881_v5 = vpop.f32.mrf.mxu0 }
 0x18a   : > { %v1457_v28 = vpop.f32.mrf.mxu2 }
 0x18b   : > { %v1975_v29 = vadd.f32 %v1974_v9, %v1960_v57  ;;  %v1484_v13 = vadd.f32 %v1457_v28, %v1332_v26  ;;  %v1308_v37 = vpop.f32.mrf.mxu1 }
 0x18c   : > { %v1677_v50 = vpop.f32.mrf.mxu3  ;;  %v1333_v41 = vadd.f32 %v1308_v37, %v3205_v17 }
 0x18d   : > { %v1704_v2 = vadd.f32 %v1677_v50, %v1484_v13 }
 0x18f   : > { %v1908_v35 = vadd.f32 %v1881_v5, %v1704_v2 }
 0x191   : > { %1924 = vst [vmem:[%s3262_s30 + $0x48] sm:$0xff] %v1908_v35  ;;  %v1939_v39 = vadd.f32 %v1938_v40, %v1908_v35  ;;  %v1961_v16 = vmul.f32 %v1908_v35, %v1908_v35  ;;  %v1884_v42 = vpop.f32.mrf.mxu0 }
 0x192   : > { %v1460_v15 = vpop.f32.mrf.mxu2 }
 0x193   : > { %v1976_v27 = vadd.f32 %v1975_v29, %v1961_v16  ;;  %v1485_v45 = vadd.f32 %v1460_v15, %v1333_v41  ;;  %v1310_v19 = vpop.f32.mrf.mxu1 }
 0x194   : > { %v1680_v46 = vpop.f32.mrf.mxu3  ;;  %v1334_v25 = vadd.f32 %v1310_v19, %v3221_v31 }
 0x195   : > { %v1705_v55 = vadd.f32 %v1680_v46, %v1485_v45 }
 0x197   : > { %v1909_v33 = vadd.f32 %v1884_v42, %v1705_v55 }
 0x199   : > { %1925 = vst [vmem:[%s3262_s30 + $0x50] sm:$0xff] %v1909_v33  ;;  %v1940_v44 = vadd.f32 %v1939_v39, %v1909_v33  ;;  %v1962_v48 = vmul.f32 %v1909_v33, %v1909_v33  ;;  %v1886_v21 = vpop.f32.mrf.mxu0 }
 0x19a   : > { %v1462_v49 = vpop.f32.mrf.mxu2 }
 0x19b   : > { %v1977_v23 = vadd.f32 %v1976_v27, %v1962_v48  ;;  %v1486_v61 = vadd.f32 %v1462_v49, %v1334_v25  ;;  %v1313_v14 = vpop.f32.mrf.mxu1 }
 0x19c   : > { %v1682_v17 = vpop.f32.mrf.mxu3  ;;  %v1335_v56 = vadd.f32 %v1313_v14, %v3236_v59 }
 0x19d   : > { %v1706_v53 = vadd.f32 %v1682_v17, %v1486_v61 }
 0x19f   : > { %v1910_v51 = vadd.f32 %v1886_v21, %v1706_v53 }
 0x1a1   : > { %1926 = vst [vmem:[%s3262_s30 + $0x58] sm:$0xff] %v1910_v51  ;;  %v1941_v54 = vadd.f32 %v1940_v44, %v1910_v51  ;;  %v1963_v34 = vmul.f32 %v1910_v51, %v1910_v51  ;;  %v1889_v58 = vpop.f32.mrf.mxu0 }
 0x1a2   : > { %v1465_v20 = vpop.f32.mrf.mxu2 }
 0x1a3   : > { %v1978_v11 = vadd.f32 %v1977_v23, %v1963_v34  ;;  %v1487_v63 = vadd.f32 %v1465_v20, %v1335_v56  ;;  %v1315_v0 = vpop.f32.mrf.mxu1 }
 0x1a4   : > { %v1685_v31 = vpop.f32.mrf.mxu3  ;;  %v1336_v60 = vadd.f32 %v1315_v0, %v3246_v38 }
 0x1a5   : > { %v1707_v3 = vadd.f32 %v1685_v31, %v1487_v63 }
 0x1a7   : > { %v1911_v4 = vadd.f32 %v1889_v58, %v1707_v3 }
 0x1a9   : > { %1927 = vst [vmem:[%s3262_s30 + $0x60] sm:$0xff] %v1911_v4  ;;  %v1942_v32 = vadd.f32 %v1941_v54, %v1911_v4  ;;  %v1964_v52 = vmul.f32 %v1911_v4, %v1911_v4  ;;  %v1891_v47 = vpop.f32.mrf.mxu0 }
 0x1aa   : > { %v1467_v6 = vpop.f32.mrf.mxu2 }
 0x1ab   : > { %v1979_v7 = vadd.f32 %v1978_v11, %v1964_v52  ;;  %v1488_v10 = vadd.f32 %v1467_v6, %v1336_v60  ;;  %v1318_v59 = vpop.f32.mrf.mxu1 }
 0x1ac   : > { %v1687_v24 = vpop.f32.mrf.mxu3  ;;  %v1337_v18 = vadd.f32 %v1318_v59, %v3252_v30 }
 0x1ad   : > { %v1708_v8 = vadd.f32 %v1687_v24, %v1488_v10 }
 0x1af   : > { %v1912_v12 = vadd.f32 %v1891_v47, %v1708_v8 }
 0x1b1   : > { %1928 = vst [vmem:[%s3262_s30 + $0x68] sm:$0xff] %v1912_v12  ;;  %v1943_v9 = vadd.f32 %v1942_v32, %v1912_v12  ;;  %v1965_v62 = vmul.f32 %v1912_v12, %v1912_v12  ;;  %v1894_v40 = vpop.f32.mrf.mxu0 }
 0x1b2   : > { %v1470_v22 = vpop.f32.mrf.mxu2 }
 0x1b3   : > { %v1980_v36 = vadd.f32 %v1979_v7, %v1965_v62  ;;  %v1489_v1 = vadd.f32 %v1470_v22, %v1337_v18  ;;  %v1320_v26 = vpop.f32.mrf.mxu1 }
 0x1b4   : > { %v1690_v38 = vpop.f32.mrf.mxu3  ;;  %v1338_v13 = vadd.f32 %v1320_v26, %v3256_v43 }
 0x1b5   : > { %v1709_v57 = vadd.f32 %v1690_v38, %v1489_v1 }
 0x1b7   : > { %v1913_v5 = vadd.f32 %v1894_v40, %v1709_v57 }
 0x1b9   : > { %1929 = vst [vmem:[%s3262_s30 + $0x70] sm:$0xff] %v1913_v5  ;;  %v1944_v28 = vadd.f32 %v1943_v9, %v1913_v5  ;;  %v1966_v29 = vmul.f32 %v1913_v5, %v1913_v5  ;;  %v1896_v39 = vpop.f32.mrf.mxu0 }
 0x1ba   : > { %v1472_v37 = vpop.f32.mrf.mxu2 }
 0x1bb   : > { %v1981_v50 = vadd.f32 %v1980_v36, %v1966_v29  ;;  %v1490_v30 = vadd.f32 %v1472_v37, %v1338_v13 }
 0x1bc   : > { %v1692_v2 = vpop.f32.mrf.mxu3 }
 0x1bd   : > { %v1710_v35 = vadd.f32 %v1692_v2, %v1490_v30 }
 0x1bf   : > { %v1914_v16 = vadd.f32 %v1896_v39, %v1710_v35 }
 0x1c1   : > { %1930 = vst [vmem:[%s3262_s30 + $0x78] sm:$0xff] %v1914_v16  ;;  %v1945_v41 = vadd.f32 %v1944_v28, %v1914_v16  ;;  %v1967_v42 = vmul.f32 %v1914_v16, %v1914_v16 }
 0x1c3   : > { %v1946_v15 = vrot.slane %v1945_v41, 4  ;;  %v1982_v27 = vadd.f32 %v1981_v50, %v1967_v42 }
 0x1c5   : > { %v1947_v45 = vadd.f32 %v1946_v15, %v1945_v41  ;;  %v1983_v19 = vrot.slane %v1982_v27, 4 }
 0x1c7   : > { %v1948_v43 = vrot.slane %v1947_v45, 2  ;;  %v1984_v46 = vadd.f32 %v1983_v19, %v1982_v27 }
 0x1c9   : > { %v1949_v55 = vadd.f32 %v1948_v43, %v1947_v45  ;;  %v1985_v33 = vrot.slane %v1984_v46, 2 }
 0x1cb   : > { %v1950_v44 = vrot.slane %v1949_v55, 1  ;;  %v1986_v48 = vadd.f32 %v1985_v33, %v1984_v46 }
 0x1cd   : > { %v1987_v25 = vrot.slane %v1986_v48, 1  ;;  %v1951_v21 = vadd.f32 %v1950_v44, %v1949_v55 }
 0x1cf   : > { %v1988_v49 = vadd.f32 %v1987_v25, %v1986_v48 }
 0x1d1   : > { %v1990_v23 = vsel %vm1989_vm7, %v1951_v21, %v1988_v49 }
 0x1d2   : > { %v1991_v61 = vsel %vm395_vm0, %v1990_v23, 0.0 }
 0x1d3   : > { %1992 = vst [vmem:[%s216_s9] sm:$0xff] %v1991_v61 }
 0x1d4 PF: > { %s14_s16 = sadd.s32 1, %s2596_s16   ;;  %s3325_s12 = smov %s2588_s14 }
 0x1d5   : > { %p11_p8 = scmp.ge.s32.totalorder %s14_s16, 6   ;;  %s3326_s13 = smov %s2592_s15 }
 0x1d6   : > { %s3327_s14 = smov %s3330_s17  ;;  %s3328_s15 = smov %s3334_s18 }
 0x1d7   :  { %13 = sbr.rel (!%p11_p8) target bundleno = 3 (0x3), region = 73 }

</bundles_post_ra>
